<compile_context>
chip_gen: v5e
topology: v5e:2x2
jax: 0.10.0
libtpu: 0.0.40
codegen_flags: <defaults>
</compile_context>

<pallas_src>
import math
from functools import partial

import jax
import jax.numpy as jnp
from jax import lax
from jax.experimental import pallas as pl
from jax.experimental.pallas import tpu as pltpu

# ----------------------------- config (small) -----------------------------
B = 2            # batch
S = 8            # seq_len
D = 32           # embedding_dim
H = 4            # num_attention_heads
DH = 8           # head_dim
I = 64           # intermediate_size
EPS = 1e-6       # layer_norm_eps


# ------------------------------- helpers -----------------------------------
def _layernorm(x, g, b, eps):
    # x: (T, D); g, b: (1, D) -- biased variance, like torch.nn.LayerNorm
    mu = jnp.mean(x, axis=-1, keepdims=True)
    var = jnp.mean((x - mu) ** 2, axis=-1, keepdims=True)
    return (x - mu) * lax.rsqrt(var + eps) * g + b


def _gelu_tanh(x):
    c = math.sqrt(2.0 / math.pi)
    return 0.5 * x * (1.0 + jnp.tanh(c * (x + 0.044715 * x * x * x)))


# ------------------------------- kernel -----------------------------------
def siglip_block_kernel(
    x_ref,
    ln1g_ref, ln1b_ref,
    wqkv_ref, bqkv_ref, wo_ref, bo_ref,
    ln2g_ref, ln2b_ref,
    w1_ref, b1_ref, w2_ref, b2_ref,
    out_ref,
    *, num_heads, eps,
):
    seq, dim = x_ref.shape

    x = x_ref[...]                                        # (S, D) f32

    # ---- LayerNorm 1 ----
    h = _layernorm(x, ln1g_ref[...], ln1b_ref[...], eps)

    # ---- fused, head-batched QKV projection (heads already on the leading axis) ----
    # wqkv: (3H, D, DH), bqkv: (3H, 1, DH); the 1/sqrt(DH) scale is folded into the Q third.
    hb = jnp.broadcast_to(h[None, :, :], (3 * num_heads, seq, dim))
    qkv = jnp.einsum("ntd,ndk->ntk", hb, wqkv_ref[...],
                     preferred_element_type=jnp.float32) + bqkv_ref[...]   # (3H, S, DH)
    q = qkv[:num_heads]                                   # leading-dim slices (free)
    k = qkv[num_heads:2 * num_heads]
    v = qkv[2 * num_heads:]

    # ---- attention: head-batched einsums; softmax over the KV (lane) axis ----
    s = jnp.einsum("hqd,hkd->hqk", q, k, preferred_element_type=jnp.float32)   # (H, S, S)
    s = s - jnp.max(s, axis=-1, keepdims=True)
    p = jnp.exp(s)
    w = p * pl.reciprocal(jnp.sum(p, axis=-1, keepdims=True), approx=True)
    o = jnp.einsum("hqk,hkd->hqd", w, v, preferred_element_type=jnp.float32)   # (H, S, DH)

    # ---- head merge folded into the out-projection: accumulate per-head MXU matmuls ----
    wo = wo_ref[...]                                      # (H, DH, D)
    attn = jnp.dot(o[0], wo[0], preferred_element_type=jnp.float32)
    for i in range(1, num_heads):                         # small static unroll; no lane concat
        attn = attn + jnp.dot(o[i], wo[i], preferred_element_type=jnp.float32)
    attn = attn + bo_ref[...]

    x1 = x + attn                                         # residual 1

    # ---- LayerNorm 2 + MLP (gelu-tanh) ----
    h2 = _layernorm(x1, ln2g_ref[...], ln2b_ref[...], eps)
    f = jnp.dot(h2, w1_ref[...], preferred_element_type=jnp.float32) + b1_ref[...]
    f = _gelu_tanh(f)
    y = jnp.dot(f, w2_ref[...], preferred_element_type=jnp.float32) + b2_ref[...]

    out_ref[...] = x1 + y                                 # residual 2


# ------------------------------- wrapper -----------------------------------
def _resident_spec(a, pipeline_mode):
    """Full-array weight spec with a constant index_map (stays resident across grid steps)."""
    zeros = (0,) * a.ndim

    def imap(i):
        return zeros

    if pipeline_mode is None:
        return pl.BlockSpec(a.shape, imap)
    return pl.BlockSpec(a.shape, imap, pipeline_mode=pipeline_mode)


def siglip_encoder_block(x, params):
    Bsz, Ssz, Dsz = x.shape
    T = Bsz * Ssz
    scale = 1.0 / math.sqrt(DH)

    # Head-major weight layouts prepared once in the wrapper (trace-time, zero kernel cost):
    #   wqkv: (3H, D, DH)  (Q third pre-scaled by 1/sqrt(DH)),  bqkv: (3H, 1, DH),  wo: (H, DH, D)
    def to_heads_w(w):      # (D, H*DH) -> (H, D, DH)
        return w.reshape(Dsz, H, DH).transpose(1, 0, 2)

    def to_heads_b(b):      # (1, H*DH) -> (H, 1, DH)
        return b.reshape(H, 1, DH)

    wqkv = jnp.concatenate(
        [to_heads_w(params["wq"] * scale), to_heads_w(params["wk"]), to_heads_w(params["wv"])],
        axis=0)
    bqkv = jnp.concatenate(
        [to_heads_b(params["bq"] * scale), to_heads_b(params["bk"]), to_heads_b(params["bv"])],
        axis=0)
    wo = params["wo"].reshape(H, DH, Dsz)

    weights = [
        params["ln1_g"], params["ln1_b"],
        wqkv, bqkv, wo, params["bo"],
        params["ln2_g"], params["ln2_b"],
        params["w1"], params["b1"], params["w2"], params["b2"],
    ]

    kernel = partial(siglip_block_kernel, num_heads=H, eps=EPS)
    x2 = x.reshape(T, Dsz)   # contiguous, free reshape in the wrapper

    def run(weight_pipeline_mode):
        return pl.pallas_call(
            kernel,
            out_shape=jax.ShapeDtypeStruct((T, Dsz), jnp.float32),
            grid=(Bsz,),
            in_specs=[pl.BlockSpec((Ssz, Dsz), lambda i: (i, 0))]
                     + [_resident_spec(w, weight_pipeline_mode) for w in weights],
            out_specs=pl.BlockSpec((Ssz, Dsz), lambda i: (i, 0)),
            compiler_params=pltpu.CompilerParams(
                dimension_semantics=("parallel",),
                # Raise toward 64-100 MiB when scaling to real SigLIP sizes on v5e/v6e;
                # keep <= 64 MiB on v7x.
                vmem_limit_bytes=32 * 1024 * 1024,
            ),
        )(x2, *weights)

    try:
        # Single-buffer the resident weights: constant index_maps never re-fetch, so the
        # second pipeline buffer is pure VMEM waste (matters at real SigLIP sizes).
        out = run(pl.Buffered(1))
    except Exception:
        # TODO(synk): jax build without BlockSpec pipeline_mode / pl.Buffered support;
        # fall back to default double-buffered weights (correctness unaffected).
        out = run(None)

    return out.reshape(Bsz, Ssz, Dsz)


# --------------------------- pure-JAX reference -----------------------------
def reference(x, p):
    def ln(x, g, b):
        mu = jnp.mean(x, axis=-1, keepdims=True)
        var = jnp.mean((x - mu) ** 2, axis=-1, keepdims=True)
        return (x - mu) * lax.rsqrt(var + EPS) * g + b

    h = ln(x, p["ln1_g"][0], p["ln1_b"][0])
    q = h @ p["wq"] + p["bq"][0]
    k = h @ p["wk"] + p["bk"][0]
    v = h @ p["wv"] + p["bv"][0]
    q = q.reshape(B, S, H, DH).transpose(0, 2, 1, 3)
    k = k.reshape(B, S, H, DH).transpose(0, 2, 1, 3)
    v = v.reshape(B, S, H, DH).transpose(0, 2, 1, 3)
    scores = jnp.einsum("bhqd,bhkd->bhqk", q, k) / math.sqrt(DH)
    w = jax.nn.softmax(scores, axis=-1)
    a = jnp.einsum("bhqk,bhkd->bhqd", w, v).transpose(0, 2, 1, 3).reshape(B, S, H * DH)
    a = a @ p["wo"] + p["bo"][0]
    x1 = x + a
    h2 = ln(x1, p["ln2_g"][0], p["ln2_b"][0])
    f = h2 @ p["w1"] + p["b1"][0]
    c = math.sqrt(2.0 / math.pi)
    f = 0.5 * f * (1.0 + jnp.tanh(c * (f + 0.044715 * f ** 3)))
    y = f @ p["w2"] + p["b2"][0]
    return x1 + y


# --------------------------------- main -------------------------------------
if __name__ == "__main__":
    key = jax.random.PRNGKey(0)
    keys = jax.random.split(key, 16)

    # Linear weights stored as (in_features, out_features), i.e. torch weight.T,
    # so both kernel and reference compute x @ W + b directly.
    params = {
        "ln1_g": jnp.ones((1, D), jnp.float32),
        "ln1_b": jnp.zeros((1, D), jnp.float32),
        "wq": jax.random.normal(keys[0], (D, H * DH), jnp.float32) * 0.05,
        "bq": jax.random.normal(keys[1], (1, H * DH), jnp.float32) * 0.02,
        "wk": jax.random.normal(keys[2], (D, H * DH), jnp.float32) * 0.05,
        "bk": jax.random.normal(keys[3], (1, H * DH), jnp.float32) * 0.02,
        "wv": jax.random.normal(keys[4], (D, H * DH), jnp.float32) * 0.05,
        "bv": jax.random.normal(keys[5], (1, H * DH), jnp.float32) * 0.02,
        "wo": jax.random.normal(keys[6], (H * DH, D), jnp.float32) * 0.05,
        "bo": jax.random.normal(keys[7], (1, D), jnp.float32) * 0.02,
        "ln2_g": jnp.ones((1, D), jnp.float32),
        "ln2_b": jnp.zeros((1, D), jnp.float32),
        "w1": jax.random.normal(keys[8], (D, I), jnp.float32) * 0.05,
        "b1": jax.random.normal(keys[9], (1, I), jnp.float32) * 0.02,
        "w2": jax.random.normal(keys[10], (I, D), jnp.float32) * 0.05,
        "b2": jax.random.normal(keys[11], (1, D), jnp.float32) * 0.02,
    }

    x = jax.random.normal(keys[12], (B, S, D), jnp.float32)

    out = jax.block_until_ready(siglip_encoder_block(x, params))
    ref = jax.block_until_ready(reference(x, params))

    assert out.shape == (B, S, D)
    # tolerance allows for the approximate (EUP) reciprocal used in the softmax normalize
    err = float(jnp.max(jnp.abs(out - ref)))
    assert jnp.allclose(out, ref, atol=1e-3, rtol=1e-3), err
    print("KERNEL_OK")
</pallas_src>

<mosaic_0001>
module attributes {stable_mosaic.version = 11 : i64} {
  func.func @siglip_block_kernel(%arg0: i32, %arg1: memref<8x32xf32, #tpu.memory_space<vmem>>, %arg2: memref<1x32xf32, #tpu.memory_space<vmem>>, %arg3: memref<1x32xf32, #tpu.memory_space<vmem>>, %arg4: memref<12x32x8xf32, #tpu.memory_space<vmem>>, %arg5: memref<12x1x8xf32, #tpu.memory_space<vmem>>, %arg6: memref<4x8x32xf32, #tpu.memory_space<vmem>>, %arg7: memref<1x32xf32, #tpu.memory_space<vmem>>, %arg8: memref<1x32xf32, #tpu.memory_space<vmem>>, %arg9: memref<1x32xf32, #tpu.memory_space<vmem>>, %arg10: memref<32x64xf32, #tpu.memory_space<vmem>>, %arg11: memref<1x64xf32, #tpu.memory_space<vmem>>, %arg12: memref<64x32xf32, #tpu.memory_space<vmem>>, %arg13: memref<1x32xf32, #tpu.memory_space<vmem>>, %arg14: memref<8x32xf32, #tpu.memory_space<vmem>>) attributes {dimension_semantics = [#tpu.dimension_semantics<parallel>], iteration_bounds = array<i64: 2>, scalar_prefetch = 0 : i64, scratch_operands = 0 : i64, tpu.core_type = #tpu.core_type<tc>, window_params = [{transform_indices = @transform_0, window_bounds = array<i64: 8, 32>}, {pipeline_mode = #tpu.pipeline_mode<synchronous>, transform_indices = @transform_1, window_bounds = array<i64: 1, 32>}, {pipeline_mode = #tpu.pipeline_mode<synchronous>, transform_indices = @transform_2, window_bounds = array<i64: 1, 32>}, {pipeline_mode = #tpu.pipeline_mode<synchronous>, transform_indices = @transform_3, window_bounds = array<i64: 12, 32, 8>}, {pipeline_mode = #tpu.pipeline_mode<synchronous>, transform_indices = @transform_4, window_bounds = array<i64: 12, 1, 8>}, {pipeline_mode = #tpu.pipeline_mode<synchronous>, transform_indices = @transform_5, window_bounds = array<i64: 4, 8, 32>}, {pipeline_mode = #tpu.pipeline_mode<synchronous>, transform_indices = @transform_6, window_bounds = array<i64: 1, 32>}, {pipeline_mode = #tpu.pipeline_mode<synchronous>, transform_indices = @transform_7, window_bounds = array<i64: 1, 32>}, {pipeline_mode = #tpu.pipeline_mode<synchronous>, transform_indices = @transform_8, window_bounds = array<i64: 1, 32>}, {pipeline_mode = #tpu.pipeline_mode<synchronous>, transform_indices = @transform_9, window_bounds = array<i64: 32, 64>}, {pipeline_mode = #tpu.pipeline_mode<synchronous>, transform_indices = @transform_10, window_bounds = array<i64: 1, 64>}, {pipeline_mode = #tpu.pipeline_mode<synchronous>, transform_indices = @transform_11, window_bounds = array<i64: 64, 32>}, {pipeline_mode = #tpu.pipeline_mode<synchronous>, transform_indices = @transform_12, window_bounds = array<i64: 1, 32>}, {transform_indices = @transform_13, window_bounds = array<i64: 8, 32>}]} {
    %c0 = arith.constant 0 : index
    %c0_0 = arith.constant 0 : index
    %0 = vector.load %arg1[%c0, %c0_0] : memref<8x32xf32, #tpu.memory_space<vmem>>, vector<8x32xf32>
    %c0_1 = arith.constant 0 : index
    %c0_2 = arith.constant 0 : index
    %1 = vector.load %arg2[%c0_1, %c0_2] : memref<1x32xf32, #tpu.memory_space<vmem>>, vector<1x32xf32>
    %c0_3 = arith.constant 0 : index
    %c0_4 = arith.constant 0 : index
    %2 = vector.load %arg3[%c0_3, %c0_4] : memref<1x32xf32, #tpu.memory_space<vmem>>, vector<1x32xf32>
    %cst = arith.constant dense<0.000000e+00> : vector<8xf32>
    %3 = vector.multi_reduction <add>, %0, %cst [1] : vector<8x32xf32> to vector<8xf32>
    %4 = vector.shape_cast %3 : vector<8xf32> to vector<8x1xf32>
    %cst_5 = arith.constant 3.200000e+01 : f32
    %5 = vector.broadcast %cst_5 : f32 to vector<8x1xf32>
    %6 = arith.divf %4, %5 : vector<8x1xf32>
    %7 = vector.broadcast %6 : vector<8x1xf32> to vector<8x32xf32>
    %8 = arith.subf %0, %7 : vector<8x32xf32>
    %9 = arith.mulf %8, %8 : vector<8x32xf32>
    %cst_6 = arith.constant dense<0.000000e+00> : vector<8xf32>
    %10 = vector.multi_reduction <add>, %9, %cst_6 [1] : vector<8x32xf32> to vector<8xf32>
    %11 = vector.shape_cast %10 : vector<8xf32> to vector<8x1xf32>
    %cst_7 = arith.constant 3.200000e+01 : f32
    %12 = vector.broadcast %cst_7 : f32 to vector<8x1xf32>
    %13 = arith.divf %11, %12 : vector<8x1xf32>
    %14 = vector.broadcast %6 : vector<8x1xf32> to vector<8x32xf32>
    %15 = arith.subf %0, %14 : vector<8x32xf32>
    %cst_8 = arith.constant 9.99999997E-7 : f32
    %16 = vector.broadcast %cst_8 : f32 to vector<8x1xf32>
    %17 = arith.addf %13, %16 : vector<8x1xf32>
    %18 = math.rsqrt %17 : vector<8x1xf32>
    %19 = vector.broadcast %18 : vector<8x1xf32> to vector<8x32xf32>
    %20 = arith.mulf %15, %19 : vector<8x32xf32>
    %21 = vector.broadcast %1 : vector<1x32xf32> to vector<8x32xf32>
    %22 = arith.mulf %20, %21 : vector<8x32xf32>
    %23 = vector.broadcast %2 : vector<1x32xf32> to vector<8x32xf32>
    %24 = arith.addf %22, %23 : vector<8x32xf32>
    %25 = vector.shape_cast %24 : vector<8x32xf32> to vector<1x8x32xf32>
    %26 = vector.shape_cast %25 : vector<1x8x32xf32> to vector<1x8x32xf32>
    %27 = vector.broadcast %26 : vector<1x8x32xf32> to vector<12x8x32xf32>
    %c0_9 = arith.constant 0 : index
    %c0_10 = arith.constant 0 : index
    %c0_11 = arith.constant 0 : index
    %28 = vector.load %arg4[%c0_9, %c0_10, %c0_11] : memref<12x32x8xf32, #tpu.memory_space<vmem>>, vector<12x32x8xf32>
    "tpu.trace_start"() <{level = 10 : i32, message = "ntd,ndk->ntk"}> : () -> ()
    %cst_12 = arith.constant dense<0.000000e+00> : vector<12x8x8xf32>
    %29 = tpu.matmul %27, %28, %cst_12 {dimension_numbers = #tpu.dot_dimension_numbers<[2], [1], [1], [2], [0, 0, 0, 1, 1, 2], [0], [0]>} : vector<12x8x32xf32>, vector<12x32x8xf32>, vector<12x8x8xf32> -> vector<12x8x8xf32>
    "tpu.trace_stop"() : () -> ()
    %c0_13 = arith.constant 0 : index
    %c0_14 = arith.constant 0 : index
    %c0_15 = arith.constant 0 : index
    %30 = vector.load %arg5[%c0_13, %c0_14, %c0_15] : memref<12x1x8xf32, #tpu.memory_space<vmem>>, vector<12x1x8xf32>
    %31 = vector.broadcast %30 : vector<12x1x8xf32> to vector<12x8x8xf32>
    %32 = arith.addf %29, %31 : vector<12x8x8xf32>
    %33 = vector.extract_strided_slice %32 {offsets = [0, 0, 0], sizes = [4, 8, 8], strides = [1, 1, 1]} : vector<12x8x8xf32> to vector<4x8x8xf32>
    %34 = vector.extract_strided_slice %32 {offsets = [4, 0, 0], sizes = [4, 8, 8], strides = [1, 1, 1]} : vector<12x8x8xf32> to vector<4x8x8xf32>
    %35 = vector.extract_strided_slice %32 {offsets = [8, 0, 0], sizes = [4, 8, 8], strides = [1, 1, 1]} : vector<12x8x8xf32> to vector<4x8x8xf32>
    "tpu.trace_start"() <{level = 10 : i32, message = "hqd,hkd->hqk"}> : () -> ()
    %cst_16 = arith.constant dense<0.000000e+00> : vector<4x8x8xf32>
    %36 = tpu.matmul %33, %34, %cst_16 {dimension_numbers = #tpu.dot_dimension_numbers<[2], [2], [1], [1], [0, 0, 0, 1, 1, 1], [0], [0]>} : vector<4x8x8xf32>, vector<4x8x8xf32>, vector<4x8x8xf32> -> vector<4x8x8xf32>
    "tpu.trace_stop"() : () -> ()
    %cst_17 = arith.constant dense<0xFF800000> : vector<4x8xf32>
    %37 = vector.multi_reduction <maximumf>, %36, %cst_17 [2] : vector<4x8x8xf32> to vector<4x8xf32>
    %38 = vector.shape_cast %37 : vector<4x8xf32> to vector<4x8x1xf32>
    %39 = vector.broadcast %38 : vector<4x8x1xf32> to vector<4x8x8xf32>
    %40 = arith.subf %36, %39 : vector<4x8x8xf32>
    %41 = math.exp %40 : vector<4x8x8xf32>
    %cst_18 = arith.constant dense<0.000000e+00> : vector<4x8xf32>
    %42 = vector.multi_reduction <add>, %41, %cst_18 [2] : vector<4x8x8xf32> to vector<4x8xf32>
    %43 = vector.shape_cast %42 : vector<4x8xf32> to vector<4x8x1xf32>
    %44 = tpu.reciprocal %43 {approx = true} : vector<4x8x1xf32> -> vector<4x8x1xf32>
    %45 = vector.broadcast %44 : vector<4x8x1xf32> to vector<4x8x8xf32>
    %46 = arith.mulf %41, %45 : vector<4x8x8xf32>
    "tpu.trace_start"() <{level = 10 : i32, message = "hqk,hkd->hqd"}> : () -> ()
    %cst_19 = arith.constant dense<0.000000e+00> : vector<4x8x8xf32>
    %47 = tpu.matmul %46, %35, %cst_19 {dimension_numbers = #tpu.dot_dimension_numbers<[2], [1], [1], [2], [0, 0, 0, 1, 1, 2], [0], [0]>} : vector<4x8x8xf32>, vector<4x8x8xf32>, vector<4x8x8xf32> -> vector<4x8x8xf32>
    "tpu.trace_stop"() : () -> ()
    %c0_20 = arith.constant 0 : index
    %c0_21 = arith.constant 0 : index
    %c0_22 = arith.constant 0 : index
    %48 = vector.load %arg6[%c0_20, %c0_21, %c0_22] : memref<4x8x32xf32, #tpu.memory_space<vmem>>, vector<4x8x32xf32>
    %49 = vector.extract_strided_slice %47 {offsets = [0, 0, 0], sizes = [1, 8, 8], strides = [1, 1, 1]} : vector<4x8x8xf32> to vector<1x8x8xf32>
    %50 = vector.shape_cast %49 : vector<1x8x8xf32> to vector<8x8xf32>
    %51 = vector.extract_strided_slice %48 {offsets = [0, 0, 0], sizes = [1, 8, 32], strides = [1, 1, 1]} : vector<4x8x32xf32> to vector<1x8x32xf32>
    %52 = vector.shape_cast %51 : vector<1x8x32xf32> to vector<8x32xf32>
    %cst_23 = arith.constant dense<0.000000e+00> : vector<8x32xf32>
    %53 = tpu.matmul %50, %52, %cst_23 {dimension_numbers = #tpu.dot_dimension_numbers<[1], [0], [0], [1], [0, 0, 1, 1], [], []>} : vector<8x8xf32>, vector<8x32xf32>, vector<8x32xf32> -> vector<8x32xf32>
    %54 = vector.extract_strided_slice %47 {offsets = [1, 0, 0], sizes = [1, 8, 8], strides = [1, 1, 1]} : vector<4x8x8xf32> to vector<1x8x8xf32>
    %55 = vector.shape_cast %54 : vector<1x8x8xf32> to vector<8x8xf32>
    %56 = vector.extract_strided_slice %48 {offsets = [1, 0, 0], sizes = [1, 8, 32], strides = [1, 1, 1]} : vector<4x8x32xf32> to vector<1x8x32xf32>
    %57 = vector.shape_cast %56 : vector<1x8x32xf32> to vector<8x32xf32>
    %cst_24 = arith.constant dense<0.000000e+00> : vector<8x32xf32>
    %58 = tpu.matmul %55, %57, %cst_24 {dimension_numbers = #tpu.dot_dimension_numbers<[1], [0], [0], [1], [0, 0, 1, 1], [], []>} : vector<8x8xf32>, vector<8x32xf32>, vector<8x32xf32> -> vector<8x32xf32>
    %59 = arith.addf %53, %58 : vector<8x32xf32>
    %60 = vector.extract_strided_slice %47 {offsets = [2, 0, 0], sizes = [1, 8, 8], strides = [1, 1, 1]} : vector<4x8x8xf32> to vector<1x8x8xf32>
    %61 = vector.shape_cast %60 : vector<1x8x8xf32> to vector<8x8xf32>
    %62 = vector.extract_strided_slice %48 {offsets = [2, 0, 0], sizes = [1, 8, 32], strides = [1, 1, 1]} : vector<4x8x32xf32> to vector<1x8x32xf32>
    %63 = vector.shape_cast %62 : vector<1x8x32xf32> to vector<8x32xf32>
    %cst_25 = arith.constant dense<0.000000e+00> : vector<8x32xf32>
    %64 = tpu.matmul %61, %63, %cst_25 {dimension_numbers = #tpu.dot_dimension_numbers<[1], [0], [0], [1], [0, 0, 1, 1], [], []>} : vector<8x8xf32>, vector<8x32xf32>, vector<8x32xf32> -> vector<8x32xf32>
    %65 = arith.addf %59, %64 : vector<8x32xf32>
    %66 = vector.extract_strided_slice %47 {offsets = [3, 0, 0], sizes = [1, 8, 8], strides = [1, 1, 1]} : vector<4x8x8xf32> to vector<1x8x8xf32>
    %67 = vector.shape_cast %66 : vector<1x8x8xf32> to vector<8x8xf32>
    %68 = vector.extract_strided_slice %48 {offsets = [3, 0, 0], sizes = [1, 8, 32], strides = [1, 1, 1]} : vector<4x8x32xf32> to vector<1x8x32xf32>
    %69 = vector.shape_cast %68 : vector<1x8x32xf32> to vector<8x32xf32>
    %cst_26 = arith.constant dense<0.000000e+00> : vector<8x32xf32>
    %70 = tpu.matmul %67, %69, %cst_26 {dimension_numbers = #tpu.dot_dimension_numbers<[1], [0], [0], [1], [0, 0, 1, 1], [], []>} : vector<8x8xf32>, vector<8x32xf32>, vector<8x32xf32> -> vector<8x32xf32>
    %71 = arith.addf %65, %70 : vector<8x32xf32>
    %c0_27 = arith.constant 0 : index
    %c0_28 = arith.constant 0 : index
    %72 = vector.load %arg7[%c0_27, %c0_28] : memref<1x32xf32, #tpu.memory_space<vmem>>, vector<1x32xf32>
    %73 = vector.broadcast %72 : vector<1x32xf32> to vector<8x32xf32>
    %74 = arith.addf %71, %73 : vector<8x32xf32>
    %75 = arith.addf %0, %74 : vector<8x32xf32>
    %c0_29 = arith.constant 0 : index
    %c0_30 = arith.constant 0 : index
    %76 = vector.load %arg8[%c0_29, %c0_30] : memref<1x32xf32, #tpu.memory_space<vmem>>, vector<1x32xf32>
    %c0_31 = arith.constant 0 : index
    %c0_32 = arith.constant 0 : index
    %77 = vector.load %arg9[%c0_31, %c0_32] : memref<1x32xf32, #tpu.memory_space<vmem>>, vector<1x32xf32>
    %cst_33 = arith.constant dense<0.000000e+00> : vector<8xf32>
    %78 = vector.multi_reduction <add>, %75, %cst_33 [1] : vector<8x32xf32> to vector<8xf32>
    %79 = vector.shape_cast %78 : vector<8xf32> to vector<8x1xf32>
    %cst_34 = arith.constant 3.200000e+01 : f32
    %80 = vector.broadcast %cst_34 : f32 to vector<8x1xf32>
    %81 = arith.divf %79, %80 : vector<8x1xf32>
    %82 = vector.broadcast %81 : vector<8x1xf32> to vector<8x32xf32>
    %83 = arith.subf %75, %82 : vector<8x32xf32>
    %84 = arith.mulf %83, %83 : vector<8x32xf32>
    %cst_35 = arith.constant dense<0.000000e+00> : vector<8xf32>
    %85 = vector.multi_reduction <add>, %84, %cst_35 [1] : vector<8x32xf32> to vector<8xf32>
    %86 = vector.shape_cast %85 : vector<8xf32> to vector<8x1xf32>
    %cst_36 = arith.constant 3.200000e+01 : f32
    %87 = vector.broadcast %cst_36 : f32 to vector<8x1xf32>
    %88 = arith.divf %86, %87 : vector<8x1xf32>
    %89 = vector.broadcast %81 : vector<8x1xf32> to vector<8x32xf32>
    %90 = arith.subf %75, %89 : vector<8x32xf32>
    %cst_37 = arith.constant 9.99999997E-7 : f32
    %91 = vector.broadcast %cst_37 : f32 to vector<8x1xf32>
    %92 = arith.addf %88, %91 : vector<8x1xf32>
    %93 = math.rsqrt %92 : vector<8x1xf32>
    %94 = vector.broadcast %93 : vector<8x1xf32> to vector<8x32xf32>
    %95 = arith.mulf %90, %94 : vector<8x32xf32>
    %96 = vector.broadcast %76 : vector<1x32xf32> to vector<8x32xf32>
    %97 = arith.mulf %95, %96 : vector<8x32xf32>
    %98 = vector.broadcast %77 : vector<1x32xf32> to vector<8x32xf32>
    %99 = arith.addf %97, %98 : vector<8x32xf32>
    %c0_38 = arith.constant 0 : index
    %c0_39 = arith.constant 0 : index
    %100 = vector.load %arg10[%c0_38, %c0_39] : memref<32x64xf32, #tpu.memory_space<vmem>>, vector<32x64xf32>
    %cst_40 = arith.constant dense<0.000000e+00> : vector<8x64xf32>
    %101 = tpu.matmul %99, %100, %cst_40 {dimension_numbers = #tpu.dot_dimension_numbers<[1], [0], [0], [1], [0, 0, 1, 1], [], []>} : vector<8x32xf32>, vector<32x64xf32>, vector<8x64xf32> -> vector<8x64xf32>
    %c0_41 = arith.constant 0 : index
    %c0_42 = arith.constant 0 : index
    %102 = vector.load %arg11[%c0_41, %c0_42] : memref<1x64xf32, #tpu.memory_space<vmem>>, vector<1x64xf32>
    %103 = vector.broadcast %102 : vector<1x64xf32> to vector<8x64xf32>
    %104 = arith.addf %101, %103 : vector<8x64xf32>
    %cst_43 = arith.constant 5.000000e-01 : f32
    %105 = vector.broadcast %cst_43 : f32 to vector<8x64xf32>
    %106 = arith.mulf %105, %104 : vector<8x64xf32>
    %cst_44 = arith.constant 4.471500e-02 : f32
    %107 = vector.broadcast %cst_44 : f32 to vector<8x64xf32>
    %108 = arith.mulf %107, %104 : vector<8x64xf32>
    %109 = arith.mulf %108, %104 : vector<8x64xf32>
    %110 = arith.mulf %109, %104 : vector<8x64xf32>
    %111 = arith.addf %104, %110 : vector<8x64xf32>
    %cst_45 = arith.constant 0.797884583 : f32
    %112 = vector.broadcast %cst_45 : f32 to vector<8x64xf32>
    %113 = arith.mulf %112, %111 : vector<8x64xf32>
    %114 = math.tanh %113 : vector<8x64xf32>
    %cst_46 = arith.constant 1.000000e+00 : f32
    %115 = vector.broadcast %cst_46 : f32 to vector<8x64xf32>
    %116 = arith.addf %115, %114 : vector<8x64xf32>
    %117 = arith.mulf %106, %116 : vector<8x64xf32>
    %c0_47 = arith.constant 0 : index
    %c0_48 = arith.constant 0 : index
    %118 = vector.load %arg12[%c0_47, %c0_48] : memref<64x32xf32, #tpu.memory_space<vmem>>, vector<64x32xf32>
    %cst_49 = arith.constant dense<0.000000e+00> : vector<8x32xf32>
    %119 = tpu.matmul %117, %118, %cst_49 {dimension_numbers = #tpu.dot_dimension_numbers<[1], [0], [0], [1], [0, 0, 1, 1], [], []>} : vector<8x64xf32>, vector<64x32xf32>, vector<8x32xf32> -> vector<8x32xf32>
    %c0_50 = arith.constant 0 : index
    %c0_51 = arith.constant 0 : index
    %120 = vector.load %arg13[%c0_50, %c0_51] : memref<1x32xf32, #tpu.memory_space<vmem>>, vector<1x32xf32>
    %121 = vector.broadcast %120 : vector<1x32xf32> to vector<8x32xf32>
    %122 = arith.addf %119, %121 : vector<8x32xf32>
    %123 = arith.addf %75, %122 : vector<8x32xf32>
    %c0_52 = arith.constant 0 : index
    %c0_53 = arith.constant 0 : index
    %124 = vector.load %arg14[%c0_52, %c0_53] : memref<8x32xf32, #tpu.memory_space<vmem>>, vector<8x32xf32>
    tpu.vector_store %arg14[%c0_52, %c0_53], %123 {strides = array<i32>} : memref<8x32xf32, #tpu.memory_space<vmem>>, vector<8x32xf32>,
    return
  }
  func.func @transform_0(%arg0: i32) -> (i32, i32) {
    %c0_i32 = arith.constant 0 : i32
    %c0_i32_0 = arith.constant 0 : i32
    return %arg0, %c0_i32 : i32, i32
  }
  func.func @transform_1(%arg0: i32) -> (i32, i32) {
    %c0_i32 = arith.constant 0 : i32
    %c0_i32_0 = arith.constant 0 : i32
    %c0_i32_1 = arith.constant 0 : i32
    return %c0_i32, %c0_i32_0 : i32, i32
  }
  func.func @transform_2(%arg0: i32) -> (i32, i32) {
    %c0_i32 = arith.constant 0 : i32
    %c0_i32_0 = arith.constant 0 : i32
    %c0_i32_1 = arith.constant 0 : i32
    return %c0_i32, %c0_i32_0 : i32, i32
  }
  func.func @transform_3(%arg0: i32) -> (i32, i32, i32) {
    %c0_i32 = arith.constant 0 : i32
    %c0_i32_0 = arith.constant 0 : i32
    %c0_i32_1 = arith.constant 0 : i32
    %c0_i32_2 = arith.constant 0 : i32
    return %c0_i32, %c0_i32_0, %c0_i32_1 : i32, i32, i32
  }
  func.func @transform_4(%arg0: i32) -> (i32, i32, i32) {
    %c0_i32 = arith.constant 0 : i32
    %c0_i32_0 = arith.constant 0 : i32
    %c0_i32_1 = arith.constant 0 : i32
    %c0_i32_2 = arith.constant 0 : i32
    return %c0_i32, %c0_i32_0, %c0_i32_1 : i32, i32, i32
  }
  func.func @transform_5(%arg0: i32) -> (i32, i32, i32) {
    %c0_i32 = arith.constant 0 : i32
    %c0_i32_0 = arith.constant 0 : i32
    %c0_i32_1 = arith.constant 0 : i32
    %c0_i32_2 = arith.constant 0 : i32
    return %c0_i32, %c0_i32_0, %c0_i32_1 : i32, i32, i32
  }
  func.func @transform_6(%arg0: i32) -> (i32, i32) {
    %c0_i32 = arith.constant 0 : i32
    %c0_i32_0 = arith.constant 0 : i32
    %c0_i32_1 = arith.constant 0 : i32
    return %c0_i32, %c0_i32_0 : i32, i32
  }
  func.func @transform_7(%arg0: i32) -> (i32, i32) {
    %c0_i32 = arith.constant 0 : i32
    %c0_i32_0 = arith.constant 0 : i32
    %c0_i32_1 = arith.constant 0 : i32
    return %c0_i32, %c0_i32_0 : i32, i32
  }
  func.func @transform_8(%arg0: i32) -> (i32, i32) {
    %c0_i32 = arith.constant 0 : i32
    %c0_i32_0 = arith.constant 0 : i32
    %c0_i32_1 = arith.constant 0 : i32
    return %c0_i32, %c0_i32_0 : i32, i32
  }
  func.func @transform_9(%arg0: i32) -> (i32, i32) {
    %c0_i32 = arith.constant 0 : i32
    %c0_i32_0 = arith.constant 0 : i32
    %c0_i32_1 = arith.constant 0 : i32
    return %c0_i32, %c0_i32_0 : i32, i32
  }
  func.func @transform_10(%arg0: i32) -> (i32, i32) {
    %c0_i32 = arith.constant 0 : i32
    %c0_i32_0 = arith.constant 0 : i32
    %c0_i32_1 = arith.constant 0 : i32
    return %c0_i32, %c0_i32_0 : i32, i32
  }
  func.func @transform_11(%arg0: i32) -> (i32, i32) {
    %c0_i32 = arith.constant 0 : i32
    %c0_i32_0 = arith.constant 0 : i32
    %c0_i32_1 = arith.constant 0 : i32
    return %c0_i32, %c0_i32_0 : i32, i32
  }
  func.func @transform_12(%arg0: i32) -> (i32, i32) {
    %c0_i32 = arith.constant 0 : i32
    %c0_i32_0 = arith.constant 0 : i32
    %c0_i32_1 = arith.constant 0 : i32
    return %c0_i32, %c0_i32_0 : i32, i32
  }
  func.func @transform_13(%arg0: i32) -> (i32, i32) {
    %c0_i32 = arith.constant 0 : i32
    %c0_i32_0 = arith.constant 0 : i32
    return %arg0, %c0_i32 : i32, i32
  }
}

module attributes {stable_mosaic.version = 11 : i64} {
  func.func @siglip_block_kernel(%arg0: i32, %arg1: memref<8x32xf32, #tpu.memory_space<vmem>>, %arg2: memref<1x32xf32, #tpu.memory_space<vmem>>, %arg3: memref<1x32xf32, #tpu.memory_space<vmem>>, %arg4: memref<12x32x8xf32, #tpu.memory_space<vmem>>, %arg5: memref<12x1x8xf32, #tpu.memory_space<vmem>>, %arg6: memref<4x8x32xf32, #tpu.memory_space<vmem>>, %arg7: memref<1x32xf32, #tpu.memory_space<vmem>>, %arg8: memref<1x32xf32, #tpu.memory_space<vmem>>, %arg9: memref<1x32xf32, #tpu.memory_space<vmem>>, %arg10: memref<32x64xf32, #tpu.memory_space<vmem>>, %arg11: memref<1x64xf32, #tpu.memory_space<vmem>>, %arg12: memref<64x32xf32, #tpu.memory_space<vmem>>, %arg13: memref<1x32xf32, #tpu.memory_space<vmem>>, %arg14: memref<8x32xf32, #tpu.memory_space<vmem>>) attributes {dimension_semantics = [#tpu.dimension_semantics<parallel>], iteration_bounds = array<i64: 2>, scalar_prefetch = 0 : i64, scratch_operands = 0 : i64, tpu.core_type = #tpu.core_type<tc>, window_params = [{transform_indices = @transform_0, window_bounds = array<i64: 8, 32>}, {pipeline_mode = #tpu.pipeline_mode<synchronous>, transform_indices = @transform_1, window_bounds = array<i64: 1, 32>}, {pipeline_mode = #tpu.pipeline_mode<synchronous>, transform_indices = @transform_2, window_bounds = array<i64: 1, 32>}, {pipeline_mode = #tpu.pipeline_mode<synchronous>, transform_indices = @transform_3, window_bounds = array<i64: 12, 32, 8>}, {pipeline_mode = #tpu.pipeline_mode<synchronous>, transform_indices = @transform_4, window_bounds = array<i64: 12, 1, 8>}, {pipeline_mode = #tpu.pipeline_mode<synchronous>, transform_indices = @transform_5, window_bounds = array<i64: 4, 8, 32>}, {pipeline_mode = #tpu.pipeline_mode<synchronous>, transform_indices = @transform_6, window_bounds = array<i64: 1, 32>}, {pipeline_mode = #tpu.pipeline_mode<synchronous>, transform_indices = @transform_7, window_bounds = array<i64: 1, 32>}, {pipeline_mode = #tpu.pipeline_mode<synchronous>, transform_indices = @transform_8, window_bounds = array<i64: 1, 32>}, {pipeline_mode = #tpu.pipeline_mode<synchronous>, transform_indices = @transform_9, window_bounds = array<i64: 32, 64>}, {pipeline_mode = #tpu.pipeline_mode<synchronous>, transform_indices = @transform_10, window_bounds = array<i64: 1, 64>}, {pipeline_mode = #tpu.pipeline_mode<synchronous>, transform_indices = @transform_11, window_bounds = array<i64: 64, 32>}, {pipeline_mode = #tpu.pipeline_mode<synchronous>, transform_indices = @transform_12, window_bounds = array<i64: 1, 32>}, {transform_indices = @transform_13, window_bounds = array<i64: 8, 32>}]} {
    %c0 = arith.constant 0 : index
    %c0_0 = arith.constant 0 : index
    %0 = vector.load %arg1[%c0, %c0_0] : memref<8x32xf32, #tpu.memory_space<vmem>>, vector<8x32xf32>
    %c0_1 = arith.constant 0 : index
    %c0_2 = arith.constant 0 : index
    %1 = vector.load %arg2[%c0_1, %c0_2] : memref<1x32xf32, #tpu.memory_space<vmem>>, vector<1x32xf32>
    %c0_3 = arith.constant 0 : index
    %c0_4 = arith.constant 0 : index
    %2 = vector.load %arg3[%c0_3, %c0_4] : memref<1x32xf32, #tpu.memory_space<vmem>>, vector<1x32xf32>
    %cst = arith.constant dense<0.000000e+00> : vector<8xf32>
    %3 = vector.multi_reduction <add>, %0, %cst [1] : vector<8x32xf32> to vector<8xf32>
    %4 = vector.shape_cast %3 : vector<8xf32> to vector<8x1xf32>
    %cst_5 = arith.constant 3.200000e+01 : f32
    %5 = vector.broadcast %cst_5 : f32 to vector<8x1xf32>
    %6 = arith.divf %4, %5 : vector<8x1xf32>
    %7 = vector.broadcast %6 : vector<8x1xf32> to vector<8x32xf32>
    %8 = arith.subf %0, %7 : vector<8x32xf32>
    %9 = arith.mulf %8, %8 : vector<8x32xf32>
    %cst_6 = arith.constant dense<0.000000e+00> : vector<8xf32>
    %10 = vector.multi_reduction <add>, %9, %cst_6 [1] : vector<8x32xf32> to vector<8xf32>
    %11 = vector.shape_cast %10 : vector<8xf32> to vector<8x1xf32>
    %cst_7 = arith.constant 3.200000e+01 : f32
    %12 = vector.broadcast %cst_7 : f32 to vector<8x1xf32>
    %13 = arith.divf %11, %12 : vector<8x1xf32>
    %14 = vector.broadcast %6 : vector<8x1xf32> to vector<8x32xf32>
    %15 = arith.subf %0, %14 : vector<8x32xf32>
    %cst_8 = arith.constant 9.99999997E-7 : f32
    %16 = vector.broadcast %cst_8 : f32 to vector<8x1xf32>
    %17 = arith.addf %13, %16 : vector<8x1xf32>
    %18 = math.rsqrt %17 : vector<8x1xf32>
    %19 = vector.broadcast %18 : vector<8x1xf32> to vector<8x32xf32>
    %20 = arith.mulf %15, %19 : vector<8x32xf32>
    %21 = vector.broadcast %1 : vector<1x32xf32> to vector<8x32xf32>
    %22 = arith.mulf %20, %21 : vector<8x32xf32>
    %23 = vector.broadcast %2 : vector<1x32xf32> to vector<8x32xf32>
    %24 = arith.addf %22, %23 : vector<8x32xf32>
    %25 = vector.shape_cast %24 : vector<8x32xf32> to vector<1x8x32xf32>
    %26 = vector.shape_cast %25 : vector<1x8x32xf32> to vector<1x8x32xf32>
    %27 = vector.broadcast %26 : vector<1x8x32xf32> to vector<12x8x32xf32>
    %c0_9 = arith.constant 0 : index
    %c0_10 = arith.constant 0 : index
    %c0_11 = arith.constant 0 : index
    %28 = vector.load %arg4[%c0_9, %c0_10, %c0_11] : memref<12x32x8xf32, #tpu.memory_space<vmem>>, vector<12x32x8xf32>
    "tpu.trace_start"() <{level = 10 : i32, message = "ntd,ndk->ntk"}> : () -> ()
    %cst_12 = arith.constant dense<0.000000e+00> : vector<12x8x8xf32>
    %29 = tpu.matmul %27, %28, %cst_12 {dimension_numbers = #tpu.dot_dimension_numbers<[2], [1], [1], [2], [0, 0, 0, 1, 1, 2], [0], [0]>} : vector<12x8x32xf32>, vector<12x32x8xf32>, vector<12x8x8xf32> -> vector<12x8x8xf32>
    "tpu.trace_stop"() : () -> ()
    %c0_13 = arith.constant 0 : index
    %c0_14 = arith.constant 0 : index
    %c0_15 = arith.constant 0 : index
    %30 = vector.load %arg5[%c0_13, %c0_14, %c0_15] : memref<12x1x8xf32, #tpu.memory_space<vmem>>, vector<12x1x8xf32>
    %31 = vector.broadcast %30 : vector<12x1x8xf32> to vector<12x8x8xf32>
    %32 = arith.addf %29, %31 : vector<12x8x8xf32>
    %33 = vector.extract_strided_slice %32 {offsets = [0, 0, 0], sizes = [4, 8, 8], strides = [1, 1, 1]} : vector<12x8x8xf32> to vector<4x8x8xf32>
    %34 = vector.extract_strided_slice %32 {offsets = [4, 0, 0], sizes = [4, 8, 8], strides = [1, 1, 1]} : vector<12x8x8xf32> to vector<4x8x8xf32>
    %35 = vector.extract_strided_slice %32 {offsets = [8, 0, 0], sizes = [4, 8, 8], strides = [1, 1, 1]} : vector<12x8x8xf32> to vector<4x8x8xf32>
    "tpu.trace_start"() <{level = 10 : i32, message = "hqd,hkd->hqk"}> : () -> ()
    %cst_16 = arith.constant dense<0.000000e+00> : vector<4x8x8xf32>
    %36 = tpu.matmul %33, %34, %cst_16 {dimension_numbers = #tpu.dot_dimension_numbers<[2], [2], [1], [1], [0, 0, 0, 1, 1, 1], [0], [0]>} : vector<4x8x8xf32>, vector<4x8x8xf32>, vector<4x8x8xf32> -> vector<4x8x8xf32>
    "tpu.trace_stop"() : () -> ()
    %cst_17 = arith.constant dense<0xFF800000> : vector<4x8xf32>
    %37 = vector.multi_reduction <maximumf>, %36, %cst_17 [2] : vector<4x8x8xf32> to vector<4x8xf32>
    %38 = vector.shape_cast %37 : vector<4x8xf32> to vector<4x8x1xf32>
    %39 = vector.broadcast %38 : vector<4x8x1xf32> to vector<4x8x8xf32>
    %40 = arith.subf %36, %39 : vector<4x8x8xf32>
    %41 = math.exp %40 : vector<4x8x8xf32>
    %cst_18 = arith.constant dense<0.000000e+00> : vector<4x8xf32>
    %42 = vector.multi_reduction <add>, %41, %cst_18 [2] : vector<4x8x8xf32> to vector<4x8xf32>
    %43 = vector.shape_cast %42 : vector<4x8xf32> to vector<4x8x1xf32>
    %44 = tpu.reciprocal %43 {approx = true} : vector<4x8x1xf32> -> vector<4x8x1xf32>
    %45 = vector.broadcast %44 : vector<4x8x1xf32> to vector<4x8x8xf32>
    %46 = arith.mulf %41, %45 : vector<4x8x8xf32>
    "tpu.trace_start"() <{level = 10 : i32, message = "hqk,hkd->hqd"}> : () -> ()
    %cst_19 = arith.constant dense<0.000000e+00> : vector<4x8x8xf32>
    %47 = tpu.matmul %46, %35, %cst_19 {dimension_numbers = #tpu.dot_dimension_numbers<[2], [1], [1], [2], [0, 0, 0, 1, 1, 2], [0], [0]>} : vector<4x8x8xf32>, vector<4x8x8xf32>, vector<4x8x8xf32> -> vector<4x8x8xf32>
    "tpu.trace_stop"() : () -> ()
    %c0_20 = arith.constant 0 : index
    %c0_21 = arith.constant 0 : index
    %c0_22 = arith.constant 0 : index
    %48 = vector.load %arg6[%c0_20, %c0_21, %c0_22] : memref<4x8x32xf32, #tpu.memory_space<vmem>>, vector<4x8x32xf32>
    %49 = vector.extract_strided_slice %47 {offsets = [0, 0, 0], sizes = [1, 8, 8], strides = [1, 1, 1]} : vector<4x8x8xf32> to vector<1x8x8xf32>
    %50 = vector.shape_cast %49 : vector<1x8x8xf32> to vector<8x8xf32>
    %51 = vector.extract_strided_slice %48 {offsets = [0, 0, 0], sizes = [1, 8, 32], strides = [1, 1, 1]} : vector<4x8x32xf32> to vector<1x8x32xf32>
    %52 = vector.shape_cast %51 : vector<1x8x32xf32> to vector<8x32xf32>
    %cst_23 = arith.constant dense<0.000000e+00> : vector<8x32xf32>
    %53 = tpu.matmul %50, %52, %cst_23 {dimension_numbers = #tpu.dot_dimension_numbers<[1], [0], [0], [1], [0, 0, 1, 1], [], []>} : vector<8x8xf32>, vector<8x32xf32>, vector<8x32xf32> -> vector<8x32xf32>
    %54 = vector.extract_strided_slice %47 {offsets = [1, 0, 0], sizes = [1, 8, 8], strides = [1, 1, 1]} : vector<4x8x8xf32> to vector<1x8x8xf32>
    %55 = vector.shape_cast %54 : vector<1x8x8xf32> to vector<8x8xf32>
    %56 = vector.extract_strided_slice %48 {offsets = [1, 0, 0], sizes = [1, 8, 32], strides = [1, 1, 1]} : vector<4x8x32xf32> to vector<1x8x32xf32>
    %57 = vector.shape_cast %56 : vector<1x8x32xf32> to vector<8x32xf32>
    %cst_24 = arith.constant dense<0.000000e+00> : vector<8x32xf32>
    %58 = tpu.matmul %55, %57, %cst_24 {dimension_numbers = #tpu.dot_dimension_numbers<[1], [0], [0], [1], [0, 0, 1, 1], [], []>} : vector<8x8xf32>, vector<8x32xf32>, vector<8x32xf32> -> vector<8x32xf32>
    %59 = arith.addf %53, %58 : vector<8x32xf32>
    %60 = vector.extract_strided_slice %47 {offsets = [2, 0, 0], sizes = [1, 8, 8], strides = [1, 1, 1]} : vector<4x8x8xf32> to vector<1x8x8xf32>
    %61 = vector.shape_cast %60 : vector<1x8x8xf32> to vector<8x8xf32>
    %62 = vector.extract_strided_slice %48 {offsets = [2, 0, 0], sizes = [1, 8, 32], strides = [1, 1, 1]} : vector<4x8x32xf32> to vector<1x8x32xf32>
    %63 = vector.shape_cast %62 : vector<1x8x32xf32> to vector<8x32xf32>
    %cst_25 = arith.constant dense<0.000000e+00> : vector<8x32xf32>
    %64 = tpu.matmul %61, %63, %cst_25 {dimension_numbers = #tpu.dot_dimension_numbers<[1], [0], [0], [1], [0, 0, 1, 1], [], []>} : vector<8x8xf32>, vector<8x32xf32>, vector<8x32xf32> -> vector<8x32xf32>
    %65 = arith.addf %59, %64 : vector<8x32xf32>
    %66 = vector.extract_strided_slice %47 {offsets = [3, 0, 0], sizes = [1, 8, 8], strides = [1, 1, 1]} : vector<4x8x8xf32> to vector<1x8x8xf32>
    %67 = vector.shape_cast %66 : vector<1x8x8xf32> to vector<8x8xf32>
    %68 = vector.extract_strided_slice %48 {offsets = [3, 0, 0], sizes = [1, 8, 32], strides = [1, 1, 1]} : vector<4x8x32xf32> to vector<1x8x32xf32>
    %69 = vector.shape_cast %68 : vector<1x8x32xf32> to vector<8x32xf32>
    %cst_26 = arith.constant dense<0.000000e+00> : vector<8x32xf32>
    %70 = tpu.matmul %67, %69, %cst_26 {dimension_numbers = #tpu.dot_dimension_numbers<[1], [0], [0], [1], [0, 0, 1, 1], [], []>} : vector<8x8xf32>, vector<8x32xf32>, vector<8x32xf32> -> vector<8x32xf32>
    %71 = arith.addf %65, %70 : vector<8x32xf32>
    %c0_27 = arith.constant 0 : index
    %c0_28 = arith.constant 0 : index
    %72 = vector.load %arg7[%c0_27, %c0_28] : memref<1x32xf32, #tpu.memory_space<vmem>>, vector<1x32xf32>
    %73 = vector.broadcast %72 : vector<1x32xf32> to vector<8x32xf32>
    %74 = arith.addf %71, %73 : vector<8x32xf32>
    %75 = arith.addf %0, %74 : vector<8x32xf32>
    %c0_29 = arith.constant 0 : index
    %c0_30 = arith.constant 0 : index
    %76 = vector.load %arg8[%c0_29, %c0_30] : memref<1x32xf32, #tpu.memory_space<vmem>>, vector<1x32xf32>
    %c0_31 = arith.constant 0 : index
    %c0_32 = arith.constant 0 : index
    %77 = vector.load %arg9[%c0_31, %c0_32] : memref<1x32xf32, #tpu.memory_space<vmem>>, vector<1x32xf32>
    %cst_33 = arith.constant dense<0.000000e+00> : vector<8xf32>
    %78 = vector.multi_reduction <add>, %75, %cst_33 [1] : vector<8x32xf32> to vector<8xf32>
    %79 = vector.shape_cast %78 : vector<8xf32> to vector<8x1xf32>
    %cst_34 = arith.constant 3.200000e+01 : f32
    %80 = vector.broadcast %cst_34 : f32 to vector<8x1xf32>
    %81 = arith.divf %79, %80 : vector<8x1xf32>
    %82 = vector.broadcast %81 : vector<8x1xf32> to vector<8x32xf32>
    %83 = arith.subf %75, %82 : vector<8x32xf32>
    %84 = arith.mulf %83, %83 : vector<8x32xf32>
    %cst_35 = arith.constant dense<0.000000e+00> : vector<8xf32>
    %85 = vector.multi_reduction <add>, %84, %cst_35 [1] : vector<8x32xf32> to vector<8xf32>
    %86 = vector.shape_cast %85 : vector<8xf32> to vector<8x1xf32>
    %cst_36 = arith.constant 3.200000e+01 : f32
    %87 = vector.broadcast %cst_36 : f32 to vector<8x1xf32>
    %88 = arith.divf %86, %87 : vector<8x1xf32>
    %89 = vector.broadcast %81 : vector<8x1xf32> to vector<8x32xf32>
    %90 = arith.subf %75, %89 : vector<8x32xf32>
    %cst_37 = arith.constant 9.99999997E-7 : f32
    %91 = vector.broadcast %cst_37 : f32 to vector<8x1xf32>
    %92 = arith.addf %88, %91 : vector<8x1xf32>
    %93 = math.rsqrt %92 : vector<8x1xf32>
    %94 = vector.broadcast %93 : vector<8x1xf32> to vector<8x32xf32>
    %95 = arith.mulf %90, %94 : vector<8x32xf32>
    %96 = vector.broadcast %76 : vector<1x32xf32> to vector<8x32xf32>
    %97 = arith.mulf %95, %96 : vector<8x32xf32>
    %98 = vector.broadcast %77 : vector<1x32xf32> to vector<8x32xf32>
    %99 = arith.addf %97, %98 : vector<8x32xf32>
    %c0_38 = arith.constant 0 : index
    %c0_39 = arith.constant 0 : index
    %100 = vector.load %arg10[%c0_38, %c0_39] : memref<32x64xf32, #tpu.memory_space<vmem>>, vector<32x64xf32>
    %cst_40 = arith.constant dense<0.000000e+00> : vector<8x64xf32>
    %101 = tpu.matmul %99, %100, %cst_40 {dimension_numbers = #tpu.dot_dimension_numbers<[1], [0], [0], [1], [0, 0, 1, 1], [], []>} : vector<8x32xf32>, vector<32x64xf32>, vector<8x64xf32> -> vector<8x64xf32>
    %c0_41 = arith.constant 0 : index
    %c0_42 = arith.constant 0 : index
    %102 = vector.load %arg11[%c0_41, %c0_42] : memref<1x64xf32, #tpu.memory_space<vmem>>, vector<1x64xf32>
    %103 = vector.broadcast %102 : vector<1x64xf32> to vector<8x64xf32>
    %104 = arith.addf %101, %103 : vector<8x64xf32>
    %cst_43 = arith.constant 5.000000e-01 : f32
    %105 = vector.broadcast %cst_43 : f32 to vector<8x64xf32>
    %106 = arith.mulf %105, %104 : vector<8x64xf32>
    %cst_44 = arith.constant 4.471500e-02 : f32
    %107 = vector.broadcast %cst_44 : f32 to vector<8x64xf32>
    %108 = arith.mulf %107, %104 : vector<8x64xf32>
    %109 = arith.mulf %108, %104 : vector<8x64xf32>
    %110 = arith.mulf %109, %104 : vector<8x64xf32>
    %111 = arith.addf %104, %110 : vector<8x64xf32>
    %cst_45 = arith.constant 0.797884583 : f32
    %112 = vector.broadcast %cst_45 : f32 to vector<8x64xf32>
    %113 = arith.mulf %112, %111 : vector<8x64xf32>
    %114 = math.tanh %113 : vector<8x64xf32>
    %cst_46 = arith.constant 1.000000e+00 : f32
    %115 = vector.broadcast %cst_46 : f32 to vector<8x64xf32>
    %116 = arith.addf %115, %114 : vector<8x64xf32>
    %117 = arith.mulf %106, %116 : vector<8x64xf32>
    %c0_47 = arith.constant 0 : index
    %c0_48 = arith.constant 0 : index
    %118 = vector.load %arg12[%c0_47, %c0_48] : memref<64x32xf32, #tpu.memory_space<vmem>>, vector<64x32xf32>
    %cst_49 = arith.constant dense<0.000000e+00> : vector<8x32xf32>
    %119 = tpu.matmul %117, %118, %cst_49 {dimension_numbers = #tpu.dot_dimension_numbers<[1], [0], [0], [1], [0, 0, 1, 1], [], []>} : vector<8x64xf32>, vector<64x32xf32>, vector<8x32xf32> -> vector<8x32xf32>
    %c0_50 = arith.constant 0 : index
    %c0_51 = arith.constant 0 : index
    %120 = vector.load %arg13[%c0_50, %c0_51] : memref<1x32xf32, #tpu.memory_space<vmem>>, vector<1x32xf32>
    %121 = vector.broadcast %120 : vector<1x32xf32> to vector<8x32xf32>
    %122 = arith.addf %119, %121 : vector<8x32xf32>
    %123 = arith.addf %75, %122 : vector<8x32xf32>
    %c0_52 = arith.constant 0 : index
    %c0_53 = arith.constant 0 : index
    %124 = vector.load %arg14[%c0_52, %c0_53] : memref<8x32xf32, #tpu.memory_space<vmem>>, vector<8x32xf32>
    tpu.vector_store %arg14[%c0_52, %c0_53], %123 {strides = array<i32>} : memref<8x32xf32, #tpu.memory_space<vmem>>, vector<8x32xf32>,
    return
  }
  func.func @transform_0(%arg0: i32) -> (i32, i32) {
    %c0_i32 = arith.constant 0 : i32
    %c0_i32_0 = arith.constant 0 : i32
    return %arg0, %c0_i32 : i32, i32
  }
  func.func @transform_1(%arg0: i32) -> (i32, i32) {
    %c0_i32 = arith.constant 0 : i32
    %c0_i32_0 = arith.constant 0 : i32
    %c0_i32_1 = arith.constant 0 : i32
    return %c0_i32, %c0_i32_0 : i32, i32
  }
  func.func @transform_2(%arg0: i32) -> (i32, i32) {
    %c0_i32 = arith.constant 0 : i32
    %c0_i32_0 = arith.constant 0 : i32
    %c0_i32_1 = arith.constant 0 : i32
    return %c0_i32, %c0_i32_0 : i32, i32
  }
  func.func @transform_3(%arg0: i32) -> (i32, i32, i32) {
    %c0_i32 = arith.constant 0 : i32
    %c0_i32_0 = arith.constant 0 : i32
    %c0_i32_1 = arith.constant 0 : i32
    %c0_i32_2 = arith.constant 0 : i32
    return %c0_i32, %c0_i32_0, %c0_i32_1 : i32, i32, i32
  }
  func.func @transform_4(%arg0: i32) -> (i32, i32, i32) {
    %c0_i32 = arith.constant 0 : i32
    %c0_i32_0 = arith.constant 0 : i32
    %c0_i32_1 = arith.constant 0 : i32
    %c0_i32_2 = arith.constant 0 : i32
    return %c0_i32, %c0_i32_0, %c0_i32_1 : i32, i32, i32
  }
  func.func @transform_5(%arg0: i32) -> (i32, i32, i32) {
    %c0_i32 = arith.constant 0 : i32
    %c0_i32_0 = arith.constant 0 : i32
    %c0_i32_1 = arith.constant 0 : i32
    %c0_i32_2 = arith.constant 0 : i32
    return %c0_i32, %c0_i32_0, %c0_i32_1 : i32, i32, i32
  }
  func.func @transform_6(%arg0: i32) -> (i32, i32) {
    %c0_i32 = arith.constant 0 : i32
    %c0_i32_0 = arith.constant 0 : i32
    %c0_i32_1 = arith.constant 0 : i32
    return %c0_i32, %c0_i32_0 : i32, i32
  }
  func.func @transform_7(%arg0: i32) -> (i32, i32) {
    %c0_i32 = arith.constant 0 : i32
    %c0_i32_0 = arith.constant 0 : i32
    %c0_i32_1 = arith.constant 0 : i32
    return %c0_i32, %c0_i32_0 : i32, i32
  }
  func.func @transform_8(%arg0: i32) -> (i32, i32) {
    %c0_i32 = arith.constant 0 : i32
    %c0_i32_0 = arith.constant 0 : i32
    %c0_i32_1 = arith.constant 0 : i32
    return %c0_i32, %c0_i32_0 : i32, i32
  }
  func.func @transform_9(%arg0: i32) -> (i32, i32) {
    %c0_i32 = arith.constant 0 : i32
    %c0_i32_0 = arith.constant 0 : i32
    %c0_i32_1 = arith.constant 0 : i32
    return %c0_i32, %c0_i32_0 : i32, i32
  }
  func.func @transform_10(%arg0: i32) -> (i32, i32) {
    %c0_i32 = arith.constant 0 : i32
    %c0_i32_0 = arith.constant 0 : i32
    %c0_i32_1 = arith.constant 0 : i32
    return %c0_i32, %c0_i32_0 : i32, i32
  }
  func.func @transform_11(%arg0: i32) -> (i32, i32) {
    %c0_i32 = arith.constant 0 : i32
    %c0_i32_0 = arith.constant 0 : i32
    %c0_i32_1 = arith.constant 0 : i32
    return %c0_i32, %c0_i32_0 : i32, i32
  }
  func.func @transform_12(%arg0: i32) -> (i32, i32) {
    %c0_i32 = arith.constant 0 : i32
    %c0_i32_0 = arith.constant 0 : i32
    %c0_i32_1 = arith.constant 0 : i32
    return %c0_i32, %c0_i32_0 : i32, i32
  }
  func.func @transform_13(%arg0: i32) -> (i32, i32) {
    %c0_i32 = arith.constant 0 : i32
    %c0_i32_0 = arith.constant 0 : i32
    return %arg0, %c0_i32 : i32, i32
  }
}

</mosaic_0001>

<bundles_post_ra>
// kernel: tpu_custom_call.1
= control target key start
LH: loop header
LB: loop body
LE: loop exit
PB: predicated region body
PF: predicated region fallthrough
CT: control target
= control target key end

     0   :  { %s2001_s0 = inlined_call_operand.vmem [shape: f32[16,32], index: 0, kind: input, shape index: {}]   ;;  %s2002_s1 = inlined_call_operand.vmem [shape: f32[1,32], index: 1, kind: input, shape index: {}]   ;;  %s2003_s2 = inlined_call_operand.vmem [shape: f32[1,32], index: 2, kind: input, shape index: {}]   ;;  %s2004_s3 = inlined_call_operand.vmem [shape: f32[12,32,8], index: 3, kind: input, shape index: {}]   ;;  %s2005_s4 = inlined_call_operand.vmem [shape: f32[12,1,8], index: 4, kind: input, shape index: {}]   ;;  %s2006_s5 = inlined_call_operand.vmem [shape: f32[4,8,32], index: 5, kind: input, shape index: {}]   ;;  %s2007_s6 = inlined_call_operand.vmem [shape: f32[1,32], index: 6, kind: input, shape index: {}]   ;;  %s2008_s7 = inlined_call_operand.vmem [shape: f32[1,32], index: 7, kind: input, shape index: {}]   ;;  %s2009_s8 = inlined_call_operand.vmem [shape: f32[1,32], index: 8, kind: input, shape index: {}]   ;;  %s2010_s9 = inlined_call_operand.vmem [shape: f32[32,64], index: 9, kind: input, shape index: {}]   ;;  %s2011_s10 = inlined_call_operand.vmem [shape: f32[1,64], index: 10, kind: input, shape index: {}]   ;;  %s2012_s11 = inlined_call_operand.vmem [shape: f32[64,32], index: 11, kind: input, shape index: {}]   ;;  %s2013_s12 = inlined_call_operand.vmem [shape: f32[1,32], index: 12, kind: input, shape index: {}]   ;;  %s2014_s13 = inlined_call_operand.hbm [shape: f32[16,32], index: 13, kind: output, shape index: {}]  }
   0x1   :  { %2015 = sst [smem:[#allocation6_spill]] %s2001_s0 }
   0x2   :  { %2016 = sst [smem:[#allocation7_spill]] %s2002_s1 }
   0x3   :  { %2017 = sst [smem:[#allocation8_spill]] %s2003_s2 }
   0x4   :  { %18 = vsyncpa [#allocation3], 0 }
   0x5   :  { %20 = vsyncpa [#allocation3 + $0x1], 0  ;;  %s1604_s25 = smov 0   ;;  %s1606_s26 = smov 0  }
   0x6   :  { %s1608_s27 = smov 0   ;;  %s1610_s28 = smov 0  }
   0x7 LB: > { %s1625_s29 = sadd.s32 4294967295, %s1531_s28   ;;  %s1346_s30 = sadd.s32 4294967294, %s1531_s28   ;;  %s1531_s28 = sphi %s1610_s28, %s2028_s28   ;;  %s1527_s27 = sphi %s1608_s27, %s2027_s27   ;;  %s1523_s26 = sphi %s1606_s26, %s2026_s26   ;;  %s1519_s25 = sphi %s1604_s25, %s2025_s25  }
   0x8   : > { %s1629_s14 = sadd.s32 1, %s1531_s28   ;;  %s311_s15 = sadd.s32 1, %s1527_s27 }
   0x9   : > { %s308_s16 = ssub.s32 %s1531_s28, %s1629_s14  ;;  %p321_p0 = scmp.ne.s32.totalorder %s1527_s27, %s1523_s26 }
   0xa   : > { %p309_p1 = scmp.eq.s32.totalorder %s308_s16, 0  ;;  %p322_p2 = scmp.eq.s32.totalorder %s1625_s29, 1 }
   0xb   : > { %p327_p3 = scmp.ne.s32.totalorder %s1523_s26, %s1519_s25  ;;  %p328_p4 = scmp.eq.s32.totalorder %s1346_s30, 1 }
   0xc   : > { %s1640_s17 = scalar_select %p309_p1, %s1527_s27, %s311_s15  }
   0xd   : > { %p1642_p5 = por %p322_p2, %p321_p0  ;;  %p1646_p6 = por %p328_p4, %p327_p3 }
   0xe   : > { %2018 = sst [smem:[#allocation5_spill]] %s1640_s17  ;;  %p1349_p7 = scmp.ge.s32.totalorder %s1531_s28, 1 }
   0xf   : > { %p389_p8 = scmp.lt.s32.totalorder %s1531_s28, 3 }
  0x11   : > { %p390_p9 = pnand %p1349_p7, %p389_p8 }
  0x12   : > { %p432_p10 = scmp.lt.s32.totalorder (!%p390_p9), %s1625_s29, 1  ;;  %s2021_s0 = sld [smem:[#allocation6_spill]] (!%p390_p9) }
  0x13   : > { %393 = sbr.rel (%p390_p9) target bundleno = 1665 (0x681), region = 72  ;;  %s2022_s1 = sld [smem:[#allocation7_spill]] (!%p390_p9) }
  0x14   : > { %s2023_s2 = sld [smem:[#allocation8_spill]] (!%p390_p9)  ;;  %s1383_s23 = sshll.u32 (!%p390_p9), %s1625_s29, 3 }
  0x15   : > { %s1282_s15 = scalar_lea.hbm (!%p390_p9), %s2014_s13, %s1383_s23 }
  0x18   : > { %s433_s20 = scalar_select %p432_p10, %s1625_s29, 1  ;;  %vm439_vm0 = vcmask 261120   ;;  %v1533_v2 = vmov 32.0   ;;  %v480_v14 = vld [vmem:[%s2004_s3 + $0x18] sm:$0xff]  ;;  %v479_v18 = vld [vmem:[%s2004_s3 + $0x10] sm:$0xff]  ;;  %v478_v22 = vld [vmem:[%s2004_s3 + $0x8] sm:$0xff] }
  0x19   : > { %1445 = vrcp.f32 %v1533_v2  ;;  %v484_v15 = vld [vmem:[%s2004_s3 + $0x38] sm:$0xff]  ;;  %588 = vmatpush.msra.mxu0 %v480_v14  ;;  %v483_v19 = vld [vmem:[%s2004_s3 + $0x30] sm:$0xff]  ;;  %v482_v23 = vld [vmem:[%s2004_s3 + $0x28] sm:$0xff]  ;;  %vm816_vm5 = vcmask 64512   ;;  %vm1245_vm9 = vcmask 523264  }
  0x1a   : > { %s1351_s21 = sshll.u32 %s433_s20, 3  ;;  %v492_v16 = vld [vmem:[%s2004_s3 + $0x78] sm:$0xff]  ;;  %608 = vmatpush.msra.mxu2 %v484_v15  ;;  %v491_v20 = vld [vmem:[%s2004_s3 + $0x70] sm:$0xff]  ;;  %v490_v24 = vld [vmem:[%s2004_s3 + $0x68] sm:$0xff] }
  0x1b   : > { %s435_s24 = scalar_lea.vmem %s2021_s0, %s1351_s21  ;;  %v500_v17 = vld [vmem:[%s2004_s3 + $0xb8] sm:$0xff]  ;;  %648 = vmatpush.msra.mxu3 %v492_v16  ;;  %589 = vmatpush.msra.mxu0 %v479_v18  ;;  %v499_v21 = vld [vmem:[%s2004_s3 + $0xb0] sm:$0xff]  ;;  %v498_v25 = vld [vmem:[%s2004_s3 + $0xa8] sm:$0xff]  ;;  %s429_s21 = sand.u32 1, %s1523_s26  }
  0x1c   : > { %v1657_v0 = vld [vmem:[%s435_s24] sm:$0xff]  ;;  %688 = vmatpush.msra.mxu1 %v500_v17  ;;  %609 = vmatpush.msra.mxu2 %v483_v19  ;;  %v488_v30 = vld [vmem:[%s2004_s3 + $0x58] sm:$0xff]  ;;  %v487_v34 = vld [vmem:[%s2004_s3 + $0x50] sm:$0xff]  ;;  %s1350_s22 = sshll.u32 %s429_s21, 3  ;;  %s1272_s29 = scalar_lea.sflag [#allocation3], %s429_s21 }
  0x1d   : > { %v440_v1 = vsel %vm439_vm0, %v1657_v0, 0.0  ;;  %649 = vmatpush.msra.mxu3 %v491_v20  ;;  %590 = vmatpush.msra.mxu0 %v478_v22  ;;  %v477_v26 = vld [vmem:[%s2004_s3] sm:$0xff]  ;;  %v496_v31 = vld [vmem:[%s2004_s3 + $0x98] sm:$0xff]  ;;  %v495_v35 = vld [vmem:[%s2004_s3 + $0x90] sm:$0xff]  ;;  %s431_s16 = scalar_lea.vmem [#allocation2], %s1350_s22  ;;  %s1489_s22 = scalar_lea.hbm %s2014_s13, 16 }
  0x1e   : > { %441 = vadd.xlane.f32.xlu0 %v440_v1  ;;  %689 = vmatpush.msra.mxu1 %v499_v21  ;;  %v481_v27 = vld [vmem:[%s2004_s3 + $0x20] sm:$0xff]  ;;  %v508_v32 = vld [vmem:[%s2004_s3 + $0xf8] sm:$0xff]  ;;  %v507_v37 = vld [vmem:[%s2004_s3 + $0xf0] sm:$0xff]  ;;  %s1284_s20 = sshll.u32 %s431_s16, 4  ;;  %s1285_s20 = int_to_ptr.vmem [resolvable:$true] %s1284_s20 }
  0x1f   : > { %v1446_v3 = vpop.eup %1445  ;;  %610 = vmatpush.msra.mxu2 %v482_v23  ;;  %650 = vmatpush.msra.mxu3 %v490_v24  ;;  %v489_v28 = vld [vmem:[%s2004_s3 + $0x60] sm:$0xff]  ;;  %v516_v33 = vld [vmem:[%s2004_s3 + $0x138] sm:$0xff]  ;;  %v515_v38 = vld [vmem:[%s2004_s3 + $0x130] sm:$0xff] }
  0x20   : > { %v444_v4 = vmul.f32 32.0, %v1446_v3  ;;  %vm448_vm1 = vweird.f32 %v1446_v3  ;;  %690 = vmatpush.msra.mxu1 %v498_v25  ;;  %591 = vmatpush.msra.mxu0 %v477_v26  ;;  %v497_v29 = vld [vmem:[%s2004_s3 + $0xa0] sm:$0xff]  ;;  %v486_v39 = vld [vmem:[%s2004_s3 + $0x48] sm:$0xff]  ;;  %v504_v61 = vld [vmem:[%s2004_s3 + $0xd8] sm:$0xff] }
  0x21   : > { %611 = vmatpush.msra.mxu2 %v481_v27  ;;  %651 = vmatpush.msra.mxu3 %v489_v28  ;;  %v494_v41 = vld [vmem:[%s2004_s3 + $0x88] sm:$0xff]  ;;  %v485_v44 = vld [vmem:[%s2004_s3 + $0x40] sm:$0xff]  ;;  %v512_v62 = vld [vmem:[%s2004_s3 + $0x118] sm:$0xff] }
  0x22   : > { %v445_v5 = vsub.f32 1.0, %v444_v4  ;;  %691 = vmatpush.msra.mxu1 %v497_v29  ;;  %668 = vmatpush.msrb.mxu0 %v496_v31  ;;  %v506_v42 = vld [vmem:[%s2004_s3 + $0xe8] sm:$0xff]  ;;  %v493_v45 = vld [vmem:[%s2004_s3 + $0x80] sm:$0xff]  ;;  %v524_v63 = vld [vmem:[%s2004_s3 + $0x178] sm:$0xff] }
  0x23   : > { %628 = vmatpush.msrb.mxu2 %v488_v30  ;;  %728 = vmatpush.msrb.mxu3 %v508_v32  ;;  %v514_v43 = vld [vmem:[%s2004_s3 + $0x128] sm:$0xff]  ;;  %v505_v47 = vld [vmem:[%s2004_s3 + $0xe0] sm:$0xff]  ;;  %v503_v1 = vld [vmem:[%s2004_s3 + $0xd0] sm:$0xff] }
  0x24   : > { %v446_v6 = vmul.f32 %v1446_v3, %v445_v5  ;;  %768 = vmatpush.msrb.mxu1 %v516_v33  ;;  %669 = vmatpush.msrb.mxu0 %v495_v35  ;;  %v513_v48 = vld [vmem:[%s2004_s3 + $0x120] sm:$0xff]  ;;  %v511_v2 = vld [vmem:[%s2004_s3 + $0x110] sm:$0xff]  ;;  %v502_v4 = vld [vmem:[%s2004_s3 + $0xc8] sm:$0xff] }
  0x25   : > { %629 = vmatpush.msrb.mxu2 %v487_v34  ;;  %729 = vmatpush.msrb.mxu3 %v507_v37  ;;  %v1426_v55 = vld [vmem:[%s2022_s1] ss:$0 sm:$0xff]  ;;  %v510_v5 = vld [vmem:[%s2004_s3 + $0x108] sm:$0xff]  ;;  %v1429_v15 = vld [vmem:[%s2005_s4 + $0x5] ss:$0 sm:$0xff]  ;;  %s1286_s1 = sshll.u32 %s1282_s15, 4  ;;  %s1287_s1 = int_to_ptr.hbm [resolvable:$true] %s1286_s1 }
  0x26   : > { %v447_v7 = vadd.f32 %v1446_v3, %v446_v6  ;;  %769 = vmatpush.msrb.mxu1 %v515_v38  ;;  %670 = vmatpush.msrb.mxu0 %v494_v41  ;;  %v1427_v57 = vld [vmem:[%s2023_s2] ss:$0 sm:$0xff]  ;;  %v522_v6 = vld [vmem:[%s2004_s3 + $0x168] sm:$0xff]  ;;  %v1430_v19 = vld [vmem:[%s2005_s4 + $0x1] ss:$0 sm:$0xff]  ;;  %s1483_s2 = sshra.s32 %s1287_s1, 4  ;;  %s1484_s2 = int_to_ptr.hbm [resolvable:$true] %s1483_s2 }
  0x27   : > { %630 = vmatpush.msrb.mxu2 %v486_v39  ;;  %730 = vmatpush.msrb.mxu3 %v506_v42  ;;  %v517_v14 = vld [vmem:[%s2004_s3 + $0x140] sm:$0xff]  ;;  %v1433_v22 = vld [vmem:[%s2005_s4 + $0x9] ss:$0 sm:$0xff]  ;;  %v1436_v32 = vld [vmem:[%s2005_s4 + $0x8] ss:$0 sm:$0xff]  ;;  %s1485_s24 = scalar_lea.hbm %s1484_s2, 8  ;;  %p1490_p0 = scmp.lt.s32.totalorder %s1484_s2, %s2014_s13 }
  0x28   : > { %v1661_v8 = vsel %vm448_vm1, %v1446_v3, %v447_v7  ;;  %770 = vmatpush.msrb.mxu1 %v514_v43  ;;  %671 = vmatpush.msrb.mxu0 %v493_v45  ;;  %v523_v3 = vld [vmem:[%s2004_s3 + $0x170] sm:$0xff]  ;;  %v501_v7 = vld [vmem:[%s2004_s3 + $0xc0] sm:$0xff]  ;;  %v1438_v41 = vld [vmem:[%s2005_s4 + $0xb] ss:$0 sm:$0xff]  ;;  %p1486_p11 = scmp.ne.s32.totalorder %s1484_s2, %s1485_s24  ;;  %p1491_p1 = scmp.lt.s32.totalorder %s1489_s22, %s1485_s24 }
  0x29   : > { %631 = vmatpush.msrb.mxu2 %v485_v44  ;;  %731 = vmatpush.msrb.mxu3 %v505_v47  ;;  %v1432_v20 = vld [vmem:[%s2005_s4 + $0x4] ss:$0 sm:$0xff]  ;;  %v1428_v25 = vld [vmem:[%s2005_s4] ss:$0 sm:$0xff]  ;;  %v1435_v31 = vld [vmem:[%s2005_s4 + $0x7] ss:$0 sm:$0xff] }
  0x2a   : > { %771 = vmatpush.msrb.mxu1 %v513_v48  ;;  %v1431_v34 = vld [vmem:[%s2005_s4 + $0x3] ss:$0 sm:$0xff]  ;;  %v1434_v42 = vld [vmem:[%s2005_s4 + $0x2] ss:$0 sm:$0xff]  ;;  %v1439_v48 = vld [vmem:[%s2005_s4 + $0xa] ss:$0 sm:$0xff]  ;;  %p1487_p12 = pnand %p1486_p11, %p1642_p5  ;;  %p1492_p2 = por %p1491_p1, %p1490_p0 }
  0x2c   : > { %p1488_p13 = pneg %p1487_p12 }
  0x2e   : > { %p1493_p3 = pnand %p1492_p2, %p1488_p13 }
  0x91   : > { %v442_v9 = vpop.xlane.xlu0 %441 }
  0x92   : > { %v450_v10 = vmul.f32 %v1661_v8, %v442_v9  ;;  %v509_v9 = vld [vmem:[%s2004_s3 + $0x100] sm:$0xff] }
  0x94   : > { %v1665_v11 = vsub.f32 %v1657_v0, %v450_v10  ;;  %v521_v10 = vld [vmem:[%s2004_s3 + $0x160] sm:$0xff] }
  0x96   : > { %v452_v12 = vmul.f32 %v1665_v11, %v1665_v11 }
  0x98   : > { %v453_v13 = vsel %vm439_vm0, %v452_v12, 0.0  ;;  %v519_v12 = vld [vmem:[%s2004_s3 + $0x150] sm:$0xff] }
  0x99   : > { %454 = vadd.xlane.f32.xlu0 %v453_v13  ;;  %v518_v13 = vld [vmem:[%s2004_s3 + $0x148] sm:$0xff] }
 0x10c   : > { %v455_v36 = vpop.xlane.xlu0 %454 }
 0x10d   : > { %v456_v40 = vmul.f32 %v455_v36, %v1661_v8 }
 0x10f   : > { %v457_v46 = vadd.f32 1e-06, %v456_v40  ;;  %v1437_v40 = vld [vmem:[%s2005_s4 + $0x6] ss:$0 sm:$0xff] }
 0x111   : > { %1447 = vrsqrt.f32 %v457_v46  ;;  %vm464_vm3 = vweird.f32 %v457_v46 }
 0x117   : > { %v1448_v49 = vpop.eup %1447 }
 0x118   : > { %v459_v50 = vmul.f32 %v1448_v49, %v457_v46  ;;  %vm465_vm2 = vweird.f32 %v1448_v49 }
 0x119   : > { %vm466_vm4 = vmor %vm464_vm3, %vm465_vm2 }
 0x11a   : > { %v460_v51 = vmul.f32 %v1448_v49, %v459_v50 }
 0x11c   : > { %v461_v52 = vmul.f32 0.5, %v460_v51 }
 0x11e   : > { %v462_v53 = vsub.f32 1.5, %v461_v52 }
 0x120   : > { %v463_v54 = vmul.f32 %v1448_v49, %v462_v53 }
 0x122   : > { %v467_v56 = vsel %vm466_vm4, %v1448_v49, %v463_v54 }
 0x123   : > { %v468_v58 = vmul.f32 %v467_v56, %v1665_v11  ;;  %v520_v11 = vld [vmem:[%s2004_s3 + $0x158] sm:$0xff] }
 0x125   : > { %v472_v59 = vmul.f32 %v1426_v55, %v468_v58 }
 0x127   : > { %v476_v60 = vadd.f32 %v1427_v57, %v472_v59 }
 0x129   : > { %1352 = vmatmul.msk.f32.vlgmr.msra.gmra.mxu0 %vm439_vm0, %v476_v60  ;;  %1353 = vmatmul.msk.f32.vlgmr.msra.gmra.mxu2 %vm439_vm0, %v476_v60 }
 0x12a   : > { %1355 = vmatmul.msk.f32.vlgmr.msra.gmra.mxu3 %vm439_vm0, %v476_v60  ;;  %1357 = vmatmul.msk.f32.vlgmr.msra.gmra.mxu1 %vm439_vm0, %v476_v60 }
 0x12b   : > { %708 = vmatpush.msra.mxu2 %v504_v61  ;;  %748 = vmatpush.msra.mxu0 %v512_v62 }
 0x12c   : > { %808 = vmatpush.msra.mxu3 %v524_v63 }
 0x12d   : > { %709 = vmatpush.msra.mxu2 %v503_v1  ;;  %749 = vmatpush.msra.mxu0 %v511_v2 }
 0x12e   : > { %809 = vmatpush.msra.mxu3 %v523_v3 }
 0x12f   : > { %710 = vmatpush.msra.mxu2 %v502_v4  ;;  %750 = vmatpush.msra.mxu0 %v510_v5 }
 0x130   : > { %810 = vmatpush.msra.mxu3 %v522_v6 }
 0x131   : > { %1354 = vmatmul.msk.f32.vlgmr.msrb.gmra.mxu2 %vm439_vm0, %v476_v60  ;;  %1356 = vmatmul.msk.f32.vlgmr.msrb.gmra.mxu0 %vm439_vm0, %v476_v60 }
 0x132   : > { %1359 = vmatmul.msk.f32.vlgmr.msrb.gmra.mxu3 %vm439_vm0, %v476_v60  ;;  %1361 = vmatmul.msk.f32.vlgmr.msrb.gmra.mxu1 %vm439_vm0, %v476_v60 }
 0x133   : > { %711 = vmatpush.msra.mxu2 %v501_v7  ;;  %751 = vmatpush.msra.mxu0 %v509_v9 }
 0x134   : > { %811 = vmatpush.msra.mxu3 %v521_v10 }
 0x135   : > { %788 = vmatpush.msrb.mxu2 %v520_v11 }
 0x137   : > { %789 = vmatpush.msrb.mxu2 %v519_v12 }
 0x139   : > { %790 = vmatpush.msrb.mxu2 %v518_v13  ;;  %1360 = vmatmul.msk.f32.vlgmr.msra.gmra.mxu0 %vm439_vm0, %v476_v60 }
 0x13a   : > { %1358 = vmatmul.msk.f32.vlgmr.msra.gmra.mxu2 %vm439_vm0, %v476_v60  ;;  %1363 = vmatmul.msk.f32.vlgmr.msra.gmra.mxu3 %vm439_vm0, %v476_v60 }
 0x13b   : > { %791 = vmatpush.msrb.mxu2 %v517_v14 }
 0x142   : > { %1362 = vmatmul.msk.f32.vlgmr.msrb.gmra.mxu2 %vm439_vm0, %v476_v60 }
 0x1a6   : > { %v593_v16 = vpop.f32.mrf.mxu0 }
 0x1a7   : > { %v693_v17 = vpop.f32.mrf.mxu1  ;;  %v594_v30 = vadd.f32 %v1428_v25, %v593_v16 }
 0x1a8   : > { %v694_v18 = vadd.f32 %v1429_v15, %v693_v17 }
 0x1aa   : > { %1366 = vmatpush.xpose.msk.msra.mxu1 %vm816_vm5, %v694_v18 }
 0x1ac   : > { %v613_v21 = vpop.f32.mrf.mxu2 }
 0x1ad   : > { %v614_v23 = vadd.f32 %v1430_v19, %v613_v21  ;;  %v653_v24 = vpop.f32.mrf.mxu3 }
 0x1ae   : > { %v673_v26 = vpop.f32.mrf.mxu0  ;;  %v654_v39 = vadd.f32 %v1431_v34, %v653_v24 }
 0x1af   : > { %v674_v27 = vadd.f32 %v1432_v20, %v673_v26  ;;  %v773_v28 = vpop.f32.mrf.mxu1  ;;  %1367 = vmatmul.msk.f32.vlgmr.msra.gmra.mxu1 %vm816_vm5, %v614_v23 }
 0x1b0   : > { %v774_v29 = vadd.f32 %v1433_v22, %v773_v28 }
 0x1b1   : > { %1364 = vmatpush.xpose.msk.msrb.mxu0 %vm816_vm5, %v674_v27 }
 0x1b2   : > { %1006 = vmatpush.msrb.mxu1 %v774_v29  ;;  %v1057_v29 = vld [vmem:[%s2006_s5] sm:$0xff] }
 0x1b4   : > { %v633_v33 = vpop.f32.mrf.mxu2  ;;  %1365 = vmatmul.msk.f32.vlgmr.msrb.gmra.mxu0 %vm816_vm5, %v594_v30  ;;  %1102 = vmatpush.msra.mxu1 %v1057_v29  ;;  %v1059_v30 = vld [vmem:[%s2006_s5 + $0x10] sm:$0xff] }
 0x1b5   : > { %v733_v35 = vpop.f32.mrf.mxu3  ;;  %v634_v47 = vadd.f32 %v1434_v42, %v633_v33  ;;  %v1440_v42 = vld [vmem:[%s2007_s6] ss:$0 sm:$0xff] }
 0x1b6   : > { %v734_v36 = vadd.f32 %v1435_v31, %v733_v35  ;;  %v753_v37 = vpop.f32.mrf.mxu0  ;;  %v1058_v31 = vld [vmem:[%s2006_s5 + $0x8] sm:$0xff] }
 0x1b7   : > { %v754_v38 = vadd.f32 %v1436_v32, %v753_v37  ;;  %v1060_v32 = vld [vmem:[%s2006_s5 + $0x18] sm:$0xff] }
 0x1b8   : > { %1370 = vmatpush.xpose.msk.msrb.mxu3 %vm816_vm5, %v734_v36 }
 0x1b9   : > { %983 = vmatpush.msra.mxu0 %v754_v38 }
 0x1bb   : > { %1371 = vmatmul.msk.f32.vlgmr.msrb.gmra.mxu3 %vm816_vm5, %v654_v39  ;;  %1079 = vmatpush.msrb.mxu0 %v1058_v31 }
 0x1bd   : > { %v713_v43 = vpop.f32.mrf.mxu2  ;;  %v813_v45 = vpop.f32.mrf.mxu3 }
 0x1be   : > { %v714_v44 = vadd.f32 %v1437_v40, %v713_v43  ;;  %v814_v46 = vadd.f32 %v1438_v41, %v813_v45 }
 0x1c0   : > { %1368 = vmatpush.xpose.msk.msra.mxu2 %vm816_vm5, %v714_v44  ;;  %1052 = vmatpush.msra.mxu3 %v814_v46 }
 0x1c2   : > { %1149 = vmatpush.msrb.mxu3 %v1060_v32 }
 0x1c3   : > { %1369 = vmatmul.msk.f32.vlgmr.msra.gmra.mxu2 %vm816_vm5, %v634_v47 }
 0x1c5   : > { %v793_v49 = vpop.f32.mrf.mxu2 }
 0x1c6   : > { %v794_v50 = vadd.f32 %v1439_v48, %v793_v49 }
 0x1c8   : > { %1029 = vmatpush.msrb.mxu2 %v794_v50 }
 0x1ca   : > { %1125 = vmatpush.msra.mxu2 %v1059_v30 }
 0x22c   : > { %v866_v53 = vpop.f32.mrf.mxu1 }
 0x22d   : > { %v924_v54 = vsel %vm816_vm5, %v866_v53, -inf }
 0x231   : > { %v840_v51 = vpop.f32.mrf.mxu0 }
 0x232   : > { %v921_v52 = vsel %vm816_vm5, %v840_v51, -inf }
 0x233   : > { %922 = vmax.xlane.f32.xlu2 %v921_v52 }
 0x23b   : > { %925 = vmax.xlane.f32.xlu2 %v924_v54  ;;  %v1194_v54 = vld [vmem:[%s2010_s9 + $0x8] sm:$0xff] }
 0x23e   : > { %v918_v57 = vpop.f32.mrf.mxu3 }
 0x23f   : > { %v930_v58 = vsel %vm816_vm5, %v918_v57, -inf }
 0x246   : > { %v892_v55 = vpop.f32.mrf.mxu2 }
 0x247   : > { %v927_v56 = vsel %vm816_vm5, %v892_v55, -inf }
 0x248   : > { %928 = vmax.xlane.f32.xlu1 %v927_v56 }
 0x250   : > { %931 = vmax.xlane.f32.xlu1 %v930_v58 }
 0x2a6   : > { %v923_v59 = vpop.xlane.xlu2 %922 }
 0x2a7   : > { %v933_v60 = vsub.f32 %v840_v51, %v923_v59 }
 0x2a9   : > { %v937_v61 = vmul.f32 1.442695, %v933_v60 }
 0x2ab   : > { %1449 = vpow2.f32 %v937_v61 }
 0x2ae   : > { %v926_v1 = vpop.xlane.xlu2 %925 }
 0x2af   : > { %v934_v4 = vsub.f32 %v866_v53, %v926_v1  ;;  %v1196_v53 = vld [vmem:[%s2010_s9 + $0x18] sm:$0xff] }
 0x2b1   : > { %v1450_v62 = vpop.eup %1449  ;;  %v939_v6 = vmul.f32 1.442695, %v934_v4 }
 0x2b2   : > { %v945_v63 = vsel %vm816_vm5, %v1450_v62, 0.0 }
 0x2b3   : > { %946 = vadd.xlane.f32.xlu2 %v945_v63 }
 0x2bb   : > { %v929_v2 = vpop.xlane.xlu1 %928 }
 0x2bc   : > { %v935_v3 = vsub.f32 %v892_v55, %v929_v2  ;;  %v1193_v55 = vld [vmem:[%s2010_s9] sm:$0xff] }
 0x2bd   : > { %v1441_v2 = vld [vmem:[%s2008_s7] ss:$0 sm:$0xff] }
 0x2be   : > { %v941_v5 = vmul.f32 1.442695, %v935_v3 }
 0x2c0   : > { %1451 = vpow2.f32 %v941_v5 }
 0x2c1   : > { %1453 = vpow2.f32 %v939_v6 }
 0x2c3   : > { %v932_v7 = vpop.xlane.xlu1 %931 }
 0x2c4   : > { %v936_v9 = vsub.f32 %v918_v57, %v932_v7  ;;  %v1240_v7 = vld [vmem:[%s2012_s11 + $0x38] sm:$0xff] }
 0x2c6   : > { %v1452_v10 = vpop.eup %1451  ;;  %v943_v11 = vmul.f32 1.442695, %v936_v9  ;;  %v1239_v9 = vld [vmem:[%s2012_s11 + $0x30] sm:$0xff] }
 0x2c7   : > { %v951_v12 = vsel %vm816_vm5, %v1452_v10, 0.0  ;;  %v1454_v13 = vpop.eup %1453 }
 0x2c8   : > { %1455 = vpow2.f32 %v943_v11  ;;  %952 = vadd.xlane.f32.xlu0 %v951_v12  ;;  %v948_v16 = vsel %vm816_vm5, %v1454_v13, 0.0  ;;  %v1237_v11 = vld [vmem:[%s2012_s11 + $0x20] sm:$0xff]  ;;  %v1236_v12 = vld [vmem:[%s2012_s11 + $0x18] sm:$0xff] }
 0x2ce   : > { %v1456_v14 = vpop.eup %1455 }
 0x2cf   : > { %v954_v15 = vsel %vm816_vm5, %v1456_v14, 0.0 }
 0x2d0   : > { %955 = vadd.xlane.f32.xlu1 %v954_v15  ;;  %949 = vadd.xlane.f32.xlu0 %v948_v16  ;;  %v1233_v15 = vld [vmem:[%s2012_s11] sm:$0xff] }
 0x2d1   : > { %v1443_v16 = vld [vmem:[%s2011_s10] ss:$0 sm:$0xff] }
 0x326   : > { %v947_v17 = vpop.xlane.xlu2 %946 }
 0x327   : > { %1457 = vrcp.f32 %v947_v17 }
 0x32d   : > { %v1458_v18 = vpop.eup %1457 }
 0x32e   : > { %v961_v19 = vmul.f32 %v1458_v18, %v1450_v62 }
 0x330   : > { %1372 = vmatmul.msk.f32.vlgmr.msra.gmra.mxu0 %vm816_vm5, %v961_v19 }
 0x331   : > { %1216 = vmatpush.msra.mxu0 %v1196_v53 }
 0x33b   : > { %v953_v20 = vpop.xlane.xlu0 %952 }
 0x33c   : > { %1459 = vrcp.f32 %v953_v20 }
 0x342   : > { %v1460_v21 = vpop.eup %1459 }
 0x343   : > { %v963_v22 = vmul.f32 %v1460_v21, %v1452_v10  ;;  %v956_v23 = vpop.xlane.xlu1 %955  ;;  %v950_v24 = vpop.xlane.xlu0 %949  ;;  %v1238_v10 = vld [vmem:[%s2012_s11 + $0x28] sm:$0xff] }
 0x344   : > { %1461 = vrcp.f32 %v956_v23 }
 0x345   : > { %1463 = vrcp.f32 %v950_v24  ;;  %1374 = vmatmul.msk.f32.vlgmr.msrb.gmra.mxu2 %vm816_vm5, %v963_v22 }
 0x34a   : > { %v1462_v25 = vpop.eup %1461 }
 0x34b   : > { %v1464_v26 = vpop.eup %1463  ;;  %v964_v27 = vmul.f32 %v1462_v25, %v1456_v14  ;;  %v1234_v14 = vld [vmem:[%s2012_s11 + $0x8] sm:$0xff] }
 0x34c   : > { %v962_v28 = vmul.f32 %v1464_v26, %v1454_v13  ;;  %v1235_v13 = vld [vmem:[%s2012_s11 + $0x10] sm:$0xff] }
 0x34d   : > { %1375 = vmatmul.msk.f32.vlgmr.msra.gmra.mxu3 %vm816_vm5, %v964_v27 }
 0x34e   : > { %1373 = vmatmul.msk.f32.vlgmr.msrb.gmra.mxu1 %vm816_vm5, %v962_v28  ;;  %v1444_v28 = vld [vmem:[%s2013_s12] ss:$0 sm:$0xff] }
 0x34f   : > { %1257 = vmatpush.msrb.mxu1 %v1240_v7 }
 0x351   : > { %1258 = vmatpush.msrb.mxu1 %v1239_v9 }
 0x353   : > { %1259 = vmatpush.msrb.mxu1 %v1238_v10 }
 0x355   : > { %1260 = vmatpush.msrb.mxu1 %v1237_v11 }
 0x357   : > { %1261 = vmatpush.msrb.mxu1 %v1236_v12 }
 0x359   : > { %1262 = vmatpush.msrb.mxu1 %v1235_v13 }
 0x35b   : > { %1263 = vmatpush.msrb.mxu1 %v1234_v14 }
 0x35d   : > { %1264 = vmatpush.msrb.mxu1 %v1233_v15 }
 0x3ad   : > { %v985_v33 = vpop.f32.mrf.mxu0 }
 0x3ae   : > { %1377 = vmatmul.msk.f32.vlgmr.msra.gmra.mxu1 %vm816_vm5, %v985_v33 }
 0x3c8   : > { %v1031_v34 = vpop.f32.mrf.mxu2 }
 0x3c9   : > { %1378 = vmatmul.msk.f32.vlgmr.msra.gmra.mxu2 %vm816_vm5, %v1031_v34 }
 0x3cb   : > { %v1008_v35 = vpop.f32.mrf.mxu1 }
 0x3cc   : > { %1376 = vmatmul.msk.f32.vlgmr.msrb.gmra.mxu0 %vm816_vm5, %v1008_v35 }
 0x3d0   : > { %v1054_v36 = vpop.f32.mrf.mxu3 }
 0x3d1   : > { %1379 = vmatmul.msk.f32.vlgmr.msrb.gmra.mxu3 %vm816_vm5, %v1054_v36 }
 0x42b   : > { %v1104_v38 = vpop.f32.mrf.mxu1 }
 0x449   : > { %v1081_v37 = vpop.f32.mrf.mxu0 }
 0x44a   : > { %v1105_v40 = vadd.f32 %v1104_v38, %v1081_v37 }
 0x44c   : > { %v1127_v39 = vpop.f32.mrf.mxu2 }
 0x44d   : > { %v1130_v41 = vadd.f32 %v1127_v39, %v1105_v40 }
 0x454   : > { %v1151_v43 = vpop.f32.mrf.mxu3 }
 0x455   : > { %v1154_v44 = vadd.f32 %v1151_v43, %v1130_v41 }
 0x457   : > { %v1159_v45 = vadd.f32 %v1440_v42, %v1154_v44 }
 0x459   : > { %v1910_v46 = vadd.f32 %v1159_v45, %v1657_v0  ;;  %v1195_v0 = vld [vmem:[%s2010_s9 + $0x10] sm:$0xff] }
 0x45a   : > { %1217 = vmatpush.msra.mxu0 %v1195_v0 }
 0x45b   : > { %v1163_v47 = vsel %vm439_vm0, %v1910_v46, 0.0 }
 0x45c   : > { %1164 = vadd.xlane.f32.xlu1 %v1163_v47  ;;  %1218 = vmatpush.msra.mxu0 %v1194_v54 }
 0x45e   : > { %1219 = vmatpush.msra.mxu0 %v1193_v55 }
 0x4cf   : > { %v1165_v48 = vpop.xlane.xlu1 %1164 }
 0x4d0   : > { %v1166_v49 = vmul.f32 %v1165_v48, %v1661_v8 }
 0x4d2   : > { %v1167_v50 = vsub.f32 %v1910_v46, %v1166_v49 }
 0x4d4   : > { %v1168_v51 = vmul.f32 %v1167_v50, %v1167_v50 }
 0x4d6   : > { %v1169_v52 = vsel %vm439_vm0, %v1168_v51, 0.0 }
 0x4d7   : > { %1170 = vadd.xlane.f32.xlu2 %v1169_v52 }
 0x54a   : > { %v1171_v56 = vpop.xlane.xlu2 %1170 }
 0x54b   : > { %v1172_v57 = vmul.f32 %v1171_v56, %v1661_v8  ;;  %v1442_v8 = vld [vmem:[%s2009_s8] ss:$0 sm:$0xff] }
 0x54d   : > { %v1173_v58 = vadd.f32 1e-06, %v1172_v57 }
 0x54f   : > { %1465 = vrsqrt.f32 %v1173_v58  ;;  %vm1180_vm7 = vweird.f32 %v1173_v58 }
 0x555   : > { %v1466_v59 = vpop.eup %1465 }
 0x556   : > { %v1175_v60 = vmul.f32 %v1466_v59, %v1173_v58  ;;  %vm1181_vm6 = vweird.f32 %v1466_v59 }
 0x557   : > { %vm1182_vm8 = vmor %vm1180_vm7, %vm1181_vm6 }
 0x558   : > { %v1176_v61 = vmul.f32 %v1466_v59, %v1175_v60 }
 0x55a   : > { %v1177_v62 = vmul.f32 0.5, %v1176_v61 }
 0x55c   : > { %v1178_v63 = vsub.f32 1.5, %v1177_v62 }
 0x55e   : > { %v1179_v1 = vmul.f32 %v1466_v59, %v1178_v63 }
 0x560   : > { %v1183_v3 = vsel %vm1182_vm8, %v1466_v59, %v1179_v1 }
 0x561   : > { %v1184_v4 = vmul.f32 %v1183_v3, %v1167_v50 }
 0x563   : > { %v1188_v5 = vmul.f32 %v1441_v2, %v1184_v4 }
 0x565   : > { %v1192_v6 = vadd.f32 %v1442_v8, %v1188_v5 }
 0x567   : > { %1380 = vmatmul.msk.f32.vlgmr.msra.gmra.mxu0 %vm439_vm0, %v1192_v6 }
 0x5e4   : > { %v1221_v17 = vpop.f32.mrf.mxu0 }
 0x5e5   : > { %v1222_v18 = vadd.f32 %v1443_v16, %v1221_v17 }
 0x5e7   : > { %v1225_v19 = vmul.f32 0.044715, %v1222_v18  ;;  %v1224_v25 = vmul.f32 0.5, %v1222_v18 }
 0x5e9   : > { %v1226_v20 = vmul.f32 %v1225_v19, %v1222_v18 }
 0x5eb   : > { %v1227_v21 = vmul.f32 %v1226_v20, %v1222_v18 }
 0x5ed   : > { %v1228_v22 = vadd.f32 %v1227_v21, %v1222_v18 }
 0x5ef   : > { %v1229_v23 = vmul.f32 0.7978846, %v1228_v22 }
 0x5f1   : > { %1467 = vtanh.f32 %v1229_v23 }
 0x5f7   : > { %v1468_v24 = vpop.eup %1467 }
 0x5f8   : > { %v1231_v26 = vadd.f32 1.0, %v1468_v24 }
 0x5fa   : > { %v1232_v27 = vmul.f32 %v1231_v26, %v1224_v25 }
 0x5fc   : > { %1381 = vmatmul.msk.f32.vlgmr.msrb.gmra.mxu1 %vm1245_vm9, %v1232_v27 }
 0x679   : > { %v1266_v29 = vpop.f32.mrf.mxu1 }
 0x67a   : > { %v1267_v30 = vadd.f32 %v1444_v28, %v1266_v29 }
 0x67c   : > { %v1269_v31 = vadd.f32 %v1267_v30, %v1910_v46 }
 0x67e   : > { %1270 = vst.msk [vmem:[%s431_s16] sm:$0xff] %vm439_vm0, %v1269_v31 }
 0x67f   : > { %1496 = shalt.err (!%p1493_p3)
}
 0x680   : > { %1386 = dma.vmem_to_hbm [thread:$0]  (%p1642_p5), %s1285_s20, 128, %s1287_s1, %s1272_s29  }
 0x681 PF: > { %p1392_p4 = scmp.ge.s32.totalorder %s1531_s28, 2  ;;  %s1298_s21 = sand.u32 1, %s1519_s25  }
 0x682   : > { %s1299_s15 = scalar_lea.sflag [#allocation3], %s1298_s21 }
 0x683   : > { %p1389_p7 = pnand %p1392_p4, %p1646_p6 }
 0x685   : > { %p1390_p8 = pneg %p1389_p7 }
 0x687   : > { %1514 = dma.done.wait (%p1390_p8), %s1299_s15, 128  }
 0x688   : > { %1516 = vsyncadd (%p1390_p8), %s1299_s15, 4294967168  ;;  %s2024_s2 = sld [smem:[#allocation5_spill]]  ;;  %p23_p9 = scmp.ge.s32.totalorder %s1629_s14, 4  }
 0x689   : > { %s2025_s25 = smov %s1523_s26  ;;  %s2026_s26 = smov %s1527_s27 }
 0x68a   : > { %s2028_s28 = smov %s1629_s14  ;;  %25 = sbr.rel (!%p23_p9) target bundleno = 7 (0x7), region = 107 }
 0x68e   : > { %s2027_s27 = smov %s2024_s2 }
 0x68f   :  { %1305 = vsyncpa [#allocation3], 1 }
 0x690   :  { %1307 = vsyncpa [#allocation3 + $0x1], 1 }

// kernel: tpu_custom_call.1
= control target key start
LH: loop header
LB: loop body
LE: loop exit
PB: predicated region body
PF: predicated region fallthrough
CT: control target
= control target key end

     0   :  { %s2001_s0 = inlined_call_operand.vmem [shape: f32[16,32], index: 0, kind: input, shape index: {}]   ;;  %s2002_s1 = inlined_call_operand.vmem [shape: f32[1,32], index: 1, kind: input, shape index: {}]   ;;  %s2003_s2 = inlined_call_operand.vmem [shape: f32[1,32], index: 2, kind: input, shape index: {}]   ;;  %s2004_s3 = inlined_call_operand.vmem [shape: f32[12,32,8], index: 3, kind: input, shape index: {}]   ;;  %s2005_s4 = inlined_call_operand.vmem [shape: f32[12,1,8], index: 4, kind: input, shape index: {}]   ;;  %s2006_s5 = inlined_call_operand.vmem [shape: f32[4,8,32], index: 5, kind: input, shape index: {}]   ;;  %s2007_s6 = inlined_call_operand.vmem [shape: f32[1,32], index: 6, kind: input, shape index: {}]   ;;  %s2008_s7 = inlined_call_operand.vmem [shape: f32[1,32], index: 7, kind: input, shape index: {}]   ;;  %s2009_s8 = inlined_call_operand.vmem [shape: f32[1,32], index: 8, kind: input, shape index: {}]   ;;  %s2010_s9 = inlined_call_operand.vmem [shape: f32[32,64], index: 9, kind: input, shape index: {}]   ;;  %s2011_s10 = inlined_call_operand.vmem [shape: f32[1,64], index: 10, kind: input, shape index: {}]   ;;  %s2012_s11 = inlined_call_operand.vmem [shape: f32[64,32], index: 11, kind: input, shape index: {}]   ;;  %s2013_s12 = inlined_call_operand.vmem [shape: f32[1,32], index: 12, kind: input, shape index: {}]   ;;  %s2014_s13 = inlined_call_operand.hbm [shape: f32[16,32], index: 13, kind: output, shape index: {}]  }
   0x1   :  { %2015 = sst [smem:[#allocation6_spill]] %s2001_s0 }
   0x2   :  { %2016 = sst [smem:[#allocation7_spill]] %s2002_s1 }
   0x3   :  { %2017 = sst [smem:[#allocation8_spill]] %s2003_s2 }
   0x4   :  { %18 = vsyncpa [#allocation3], 0 }
   0x5   :  { %20 = vsyncpa [#allocation3 + $0x1], 0  ;;  %s1604_s25 = smov 0   ;;  %s1606_s26 = smov 0  }
   0x6   :  { %s1608_s27 = smov 0   ;;  %s1610_s28 = smov 0  }
   0x7 LB: > { %s1625_s29 = sadd.s32 4294967295, %s1531_s28   ;;  %s1346_s30 = sadd.s32 4294967294, %s1531_s28   ;;  %s1531_s28 = sphi %s1610_s28, %s2028_s28   ;;  %s1527_s27 = sphi %s1608_s27, %s2027_s27   ;;  %s1523_s26 = sphi %s1606_s26, %s2026_s26   ;;  %s1519_s25 = sphi %s1604_s25, %s2025_s25  }
   0x8   : > { %s1629_s14 = sadd.s32 1, %s1531_s28   ;;  %s311_s15 = sadd.s32 1, %s1527_s27 }
   0x9   : > { %s308_s16 = ssub.s32 %s1531_s28, %s1629_s14  ;;  %p321_p0 = scmp.ne.s32.totalorder %s1527_s27, %s1523_s26 }
   0xa   : > { %p309_p1 = scmp.eq.s32.totalorder %s308_s16, 0  ;;  %p322_p2 = scmp.eq.s32.totalorder %s1625_s29, 1 }
   0xb   : > { %p327_p3 = scmp.ne.s32.totalorder %s1523_s26, %s1519_s25  ;;  %p328_p4 = scmp.eq.s32.totalorder %s1346_s30, 1 }
   0xc   : > { %s1640_s17 = scalar_select %p309_p1, %s1527_s27, %s311_s15  }
   0xd   : > { %p1642_p5 = por %p322_p2, %p321_p0  ;;  %p1646_p6 = por %p328_p4, %p327_p3 }
   0xe   : > { %2018 = sst [smem:[#allocation5_spill]] %s1640_s17  ;;  %p1349_p7 = scmp.ge.s32.totalorder %s1531_s28, 1 }
   0xf   : > { %p389_p8 = scmp.lt.s32.totalorder %s1531_s28, 3 }
  0x11   : > { %p390_p9 = pnand %p1349_p7, %p389_p8 }
  0x12   : > { %p432_p10 = scmp.lt.s32.totalorder (!%p390_p9), %s1625_s29, 1  ;;  %s2021_s0 = sld [smem:[#allocation6_spill]] (!%p390_p9) }
  0x13   : > { %393 = sbr.rel (%p390_p9) target bundleno = 1665 (0x681), region = 72  ;;  %s2022_s1 = sld [smem:[#allocation7_spill]] (!%p390_p9) }
  0x14   : > { %s2023_s2 = sld [smem:[#allocation8_spill]] (!%p390_p9)  ;;  %s1383_s23 = sshll.u32 (!%p390_p9), %s1625_s29, 3 }
  0x15   : > { %s1282_s15 = scalar_lea.hbm (!%p390_p9), %s2014_s13, %s1383_s23 }
  0x18   : > { %s433_s20 = scalar_select %p432_p10, %s1625_s29, 1  ;;  %vm439_vm0 = vcmask 261120   ;;  %v1533_v2 = vmov 32.0   ;;  %v480_v14 = vld [vmem:[%s2004_s3 + $0x18] sm:$0xff]  ;;  %v479_v18 = vld [vmem:[%s2004_s3 + $0x10] sm:$0xff]  ;;  %v478_v22 = vld [vmem:[%s2004_s3 + $0x8] sm:$0xff] }
  0x19   : > { %1445 = vrcp.f32 %v1533_v2  ;;  %v484_v15 = vld [vmem:[%s2004_s3 + $0x38] sm:$0xff]  ;;  %588 = vmatpush.msra.mxu0 %v480_v14  ;;  %v483_v19 = vld [vmem:[%s2004_s3 + $0x30] sm:$0xff]  ;;  %v482_v23 = vld [vmem:[%s2004_s3 + $0x28] sm:$0xff]  ;;  %vm816_vm5 = vcmask 64512   ;;  %vm1245_vm9 = vcmask 523264  }
  0x1a   : > { %s1351_s21 = sshll.u32 %s433_s20, 3  ;;  %v492_v16 = vld [vmem:[%s2004_s3 + $0x78] sm:$0xff]  ;;  %608 = vmatpush.msra.mxu2 %v484_v15  ;;  %v491_v20 = vld [vmem:[%s2004_s3 + $0x70] sm:$0xff]  ;;  %v490_v24 = vld [vmem:[%s2004_s3 + $0x68] sm:$0xff] }
  0x1b   : > { %s435_s24 = scalar_lea.vmem %s2021_s0, %s1351_s21  ;;  %v500_v17 = vld [vmem:[%s2004_s3 + $0xb8] sm:$0xff]  ;;  %648 = vmatpush.msra.mxu3 %v492_v16  ;;  %589 = vmatpush.msra.mxu0 %v479_v18  ;;  %v499_v21 = vld [vmem:[%s2004_s3 + $0xb0] sm:$0xff]  ;;  %v498_v25 = vld [vmem:[%s2004_s3 + $0xa8] sm:$0xff]  ;;  %s429_s21 = sand.u32 1, %s1523_s26  }
  0x1c   : > { %v1657_v0 = vld [vmem:[%s435_s24] sm:$0xff]  ;;  %688 = vmatpush.msra.mxu1 %v500_v17  ;;  %609 = vmatpush.msra.mxu2 %v483_v19  ;;  %v488_v30 = vld [vmem:[%s2004_s3 + $0x58] sm:$0xff]  ;;  %v487_v34 = vld [vmem:[%s2004_s3 + $0x50] sm:$0xff]  ;;  %s1350_s22 = sshll.u32 %s429_s21, 3  ;;  %s1272_s29 = scalar_lea.sflag [#allocation3], %s429_s21 }
  0x1d   : > { %v440_v1 = vsel %vm439_vm0, %v1657_v0, 0.0  ;;  %649 = vmatpush.msra.mxu3 %v491_v20  ;;  %590 = vmatpush.msra.mxu0 %v478_v22  ;;  %v477_v26 = vld [vmem:[%s2004_s3] sm:$0xff]  ;;  %v496_v31 = vld [vmem:[%s2004_s3 + $0x98] sm:$0xff]  ;;  %v495_v35 = vld [vmem:[%s2004_s3 + $0x90] sm:$0xff]  ;;  %s431_s16 = scalar_lea.vmem [#allocation2], %s1350_s22  ;;  %s1489_s22 = scalar_lea.hbm %s2014_s13, 16 }
  0x1e   : > { %441 = vadd.xlane.f32.xlu0 %v440_v1  ;;  %689 = vmatpush.msra.mxu1 %v499_v21  ;;  %v481_v27 = vld [vmem:[%s2004_s3 + $0x20] sm:$0xff]  ;;  %v508_v32 = vld [vmem:[%s2004_s3 + $0xf8] sm:$0xff]  ;;  %v507_v37 = vld [vmem:[%s2004_s3 + $0xf0] sm:$0xff]  ;;  %s1284_s20 = sshll.u32 %s431_s16, 4  ;;  %s1285_s20 = int_to_ptr.vmem [resolvable:$true] %s1284_s20 }
  0x1f   : > { %v1446_v3 = vpop.eup %1445  ;;  %610 = vmatpush.msra.mxu2 %v482_v23  ;;  %650 = vmatpush.msra.mxu3 %v490_v24  ;;  %v489_v28 = vld [vmem:[%s2004_s3 + $0x60] sm:$0xff]  ;;  %v516_v33 = vld [vmem:[%s2004_s3 + $0x138] sm:$0xff]  ;;  %v515_v38 = vld [vmem:[%s2004_s3 + $0x130] sm:$0xff] }
  0x20   : > { %v444_v4 = vmul.f32 32.0, %v1446_v3  ;;  %vm448_vm1 = vweird.f32 %v1446_v3  ;;  %690 = vmatpush.msra.mxu1 %v498_v25  ;;  %591 = vmatpush.msra.mxu0 %v477_v26  ;;  %v497_v29 = vld [vmem:[%s2004_s3 + $0xa0] sm:$0xff]  ;;  %v486_v39 = vld [vmem:[%s2004_s3 + $0x48] sm:$0xff]  ;;  %v504_v61 = vld [vmem:[%s2004_s3 + $0xd8] sm:$0xff] }
  0x21   : > { %611 = vmatpush.msra.mxu2 %v481_v27  ;;  %651 = vmatpush.msra.mxu3 %v489_v28  ;;  %v494_v41 = vld [vmem:[%s2004_s3 + $0x88] sm:$0xff]  ;;  %v485_v44 = vld [vmem:[%s2004_s3 + $0x40] sm:$0xff]  ;;  %v512_v62 = vld [vmem:[%s2004_s3 + $0x118] sm:$0xff] }
  0x22   : > { %v445_v5 = vsub.f32 1.0, %v444_v4  ;;  %691 = vmatpush.msra.mxu1 %v497_v29  ;;  %668 = vmatpush.msrb.mxu0 %v496_v31  ;;  %v506_v42 = vld [vmem:[%s2004_s3 + $0xe8] sm:$0xff]  ;;  %v493_v45 = vld [vmem:[%s2004_s3 + $0x80] sm:$0xff]  ;;  %v524_v63 = vld [vmem:[%s2004_s3 + $0x178] sm:$0xff] }
  0x23   : > { %628 = vmatpush.msrb.mxu2 %v488_v30  ;;  %728 = vmatpush.msrb.mxu3 %v508_v32  ;;  %v514_v43 = vld [vmem:[%s2004_s3 + $0x128] sm:$0xff]  ;;  %v505_v47 = vld [vmem:[%s2004_s3 + $0xe0] sm:$0xff]  ;;  %v503_v1 = vld [vmem:[%s2004_s3 + $0xd0] sm:$0xff] }
  0x24   : > { %v446_v6 = vmul.f32 %v1446_v3, %v445_v5  ;;  %768 = vmatpush.msrb.mxu1 %v516_v33  ;;  %669 = vmatpush.msrb.mxu0 %v495_v35  ;;  %v513_v48 = vld [vmem:[%s2004_s3 + $0x120] sm:$0xff]  ;;  %v511_v2 = vld [vmem:[%s2004_s3 + $0x110] sm:$0xff]  ;;  %v502_v4 = vld [vmem:[%s2004_s3 + $0xc8] sm:$0xff] }
  0x25   : > { %629 = vmatpush.msrb.mxu2 %v487_v34  ;;  %729 = vmatpush.msrb.mxu3 %v507_v37  ;;  %v1426_v55 = vld [vmem:[%s2022_s1] ss:$0 sm:$0xff]  ;;  %v510_v5 = vld [vmem:[%s2004_s3 + $0x108] sm:$0xff]  ;;  %v1429_v15 = vld [vmem:[%s2005_s4 + $0x5] ss:$0 sm:$0xff]  ;;  %s1286_s1 = sshll.u32 %s1282_s15, 4  ;;  %s1287_s1 = int_to_ptr.hbm [resolvable:$true] %s1286_s1 }
  0x26   : > { %v447_v7 = vadd.f32 %v1446_v3, %v446_v6  ;;  %769 = vmatpush.msrb.mxu1 %v515_v38  ;;  %670 = vmatpush.msrb.mxu0 %v494_v41  ;;  %v1427_v57 = vld [vmem:[%s2023_s2] ss:$0 sm:$0xff]  ;;  %v522_v6 = vld [vmem:[%s2004_s3 + $0x168] sm:$0xff]  ;;  %v1430_v19 = vld [vmem:[%s2005_s4 + $0x1] ss:$0 sm:$0xff]  ;;  %s1483_s2 = sshra.s32 %s1287_s1, 4  ;;  %s1484_s2 = int_to_ptr.hbm [resolvable:$true] %s1483_s2 }
  0x27   : > { %630 = vmatpush.msrb.mxu2 %v486_v39  ;;  %730 = vmatpush.msrb.mxu3 %v506_v42  ;;  %v517_v14 = vld [vmem:[%s2004_s3 + $0x140] sm:$0xff]  ;;  %v1433_v22 = vld [vmem:[%s2005_s4 + $0x9] ss:$0 sm:$0xff]  ;;  %v1436_v32 = vld [vmem:[%s2005_s4 + $0x8] ss:$0 sm:$0xff]  ;;  %s1485_s24 = scalar_lea.hbm %s1484_s2, 8  ;;  %p1490_p0 = scmp.lt.s32.totalorder %s1484_s2, %s2014_s13 }
  0x28   : > { %v1661_v8 = vsel %vm448_vm1, %v1446_v3, %v447_v7  ;;  %770 = vmatpush.msrb.mxu1 %v514_v43  ;;  %671 = vmatpush.msrb.mxu0 %v493_v45  ;;  %v523_v3 = vld [vmem:[%s2004_s3 + $0x170] sm:$0xff]  ;;  %v501_v7 = vld [vmem:[%s2004_s3 + $0xc0] sm:$0xff]  ;;  %v1438_v41 = vld [vmem:[%s2005_s4 + $0xb] ss:$0 sm:$0xff]  ;;  %p1486_p11 = scmp.ne.s32.totalorder %s1484_s2, %s1485_s24  ;;  %p1491_p1 = scmp.lt.s32.totalorder %s1489_s22, %s1485_s24 }
  0x29   : > { %631 = vmatpush.msrb.mxu2 %v485_v44  ;;  %731 = vmatpush.msrb.mxu3 %v505_v47  ;;  %v1432_v20 = vld [vmem:[%s2005_s4 + $0x4] ss:$0 sm:$0xff]  ;;  %v1428_v25 = vld [vmem:[%s2005_s4] ss:$0 sm:$0xff]  ;;  %v1435_v31 = vld [vmem:[%s2005_s4 + $0x7] ss:$0 sm:$0xff] }
  0x2a   : > { %771 = vmatpush.msrb.mxu1 %v513_v48  ;;  %v1431_v34 = vld [vmem:[%s2005_s4 + $0x3] ss:$0 sm:$0xff]  ;;  %v1434_v42 = vld [vmem:[%s2005_s4 + $0x2] ss:$0 sm:$0xff]  ;;  %v1439_v48 = vld [vmem:[%s2005_s4 + $0xa] ss:$0 sm:$0xff]  ;;  %p1487_p12 = pnand %p1486_p11, %p1642_p5  ;;  %p1492_p2 = por %p1491_p1, %p1490_p0 }
  0x2c   : > { %p1488_p13 = pneg %p1487_p12 }
  0x2e   : > { %p1493_p3 = pnand %p1492_p2, %p1488_p13 }
  0x91   : > { %v442_v9 = vpop.xlane.xlu0 %441 }
  0x92   : > { %v450_v10 = vmul.f32 %v1661_v8, %v442_v9  ;;  %v509_v9 = vld [vmem:[%s2004_s3 + $0x100] sm:$0xff] }
  0x94   : > { %v1665_v11 = vsub.f32 %v1657_v0, %v450_v10  ;;  %v521_v10 = vld [vmem:[%s2004_s3 + $0x160] sm:$0xff] }
  0x96   : > { %v452_v12 = vmul.f32 %v1665_v11, %v1665_v11 }
  0x98   : > { %v453_v13 = vsel %vm439_vm0, %v452_v12, 0.0  ;;  %v519_v12 = vld [vmem:[%s2004_s3 + $0x150] sm:$0xff] }
  0x99   : > { %454 = vadd.xlane.f32.xlu0 %v453_v13  ;;  %v518_v13 = vld [vmem:[%s2004_s3 + $0x148] sm:$0xff] }
 0x10c   : > { %v455_v36 = vpop.xlane.xlu0 %454 }
 0x10d   : > { %v456_v40 = vmul.f32 %v455_v36, %v1661_v8 }
 0x10f   : > { %v457_v46 = vadd.f32 1e-06, %v456_v40  ;;  %v1437_v40 = vld [vmem:[%s2005_s4 + $0x6] ss:$0 sm:$0xff] }
 0x111   : > { %1447 = vrsqrt.f32 %v457_v46  ;;  %vm464_vm3 = vweird.f32 %v457_v46 }
 0x117   : > { %v1448_v49 = vpop.eup %1447 }
 0x118   : > { %v459_v50 = vmul.f32 %v1448_v49, %v457_v46  ;;  %vm465_vm2 = vweird.f32 %v1448_v49 }
 0x119   : > { %vm466_vm4 = vmor %vm464_vm3, %vm465_vm2 }
 0x11a   : > { %v460_v51 = vmul.f32 %v1448_v49, %v459_v50 }
 0x11c   : > { %v461_v52 = vmul.f32 0.5, %v460_v51 }
 0x11e   : > { %v462_v53 = vsub.f32 1.5, %v461_v52 }
 0x120   : > { %v463_v54 = vmul.f32 %v1448_v49, %v462_v53 }
 0x122   : > { %v467_v56 = vsel %vm466_vm4, %v1448_v49, %v463_v54 }
 0x123   : > { %v468_v58 = vmul.f32 %v467_v56, %v1665_v11  ;;  %v520_v11 = vld [vmem:[%s2004_s3 + $0x158] sm:$0xff] }
 0x125   : > { %v472_v59 = vmul.f32 %v1426_v55, %v468_v58 }
 0x127   : > { %v476_v60 = vadd.f32 %v1427_v57, %v472_v59 }
 0x129   : > { %1352 = vmatmul.msk.f32.vlgmr.msra.gmra.mxu0 %vm439_vm0, %v476_v60  ;;  %1353 = vmatmul.msk.f32.vlgmr.msra.gmra.mxu2 %vm439_vm0, %v476_v60 }
 0x12a   : > { %1355 = vmatmul.msk.f32.vlgmr.msra.gmra.mxu3 %vm439_vm0, %v476_v60  ;;  %1357 = vmatmul.msk.f32.vlgmr.msra.gmra.mxu1 %vm439_vm0, %v476_v60 }
 0x12b   : > { %708 = vmatpush.msra.mxu2 %v504_v61  ;;  %748 = vmatpush.msra.mxu0 %v512_v62 }
 0x12c   : > { %808 = vmatpush.msra.mxu3 %v524_v63 }
 0x12d   : > { %709 = vmatpush.msra.mxu2 %v503_v1  ;;  %749 = vmatpush.msra.mxu0 %v511_v2 }
 0x12e   : > { %809 = vmatpush.msra.mxu3 %v523_v3 }
 0x12f   : > { %710 = vmatpush.msra.mxu2 %v502_v4  ;;  %750 = vmatpush.msra.mxu0 %v510_v5 }
 0x130   : > { %810 = vmatpush.msra.mxu3 %v522_v6 }
 0x131   : > { %1354 = vmatmul.msk.f32.vlgmr.msrb.gmra.mxu2 %vm439_vm0, %v476_v60  ;;  %1356 = vmatmul.msk.f32.vlgmr.msrb.gmra.mxu0 %vm439_vm0, %v476_v60 }
 0x132   : > { %1359 = vmatmul.msk.f32.vlgmr.msrb.gmra.mxu3 %vm439_vm0, %v476_v60  ;;  %1361 = vmatmul.msk.f32.vlgmr.msrb.gmra.mxu1 %vm439_vm0, %v476_v60 }
 0x133   : > { %711 = vmatpush.msra.mxu2 %v501_v7  ;;  %751 = vmatpush.msra.mxu0 %v509_v9 }
 0x134   : > { %811 = vmatpush.msra.mxu3 %v521_v10 }
 0x135   : > { %788 = vmatpush.msrb.mxu2 %v520_v11 }
 0x137   : > { %789 = vmatpush.msrb.mxu2 %v519_v12 }
 0x139   : > { %790 = vmatpush.msrb.mxu2 %v518_v13  ;;  %1360 = vmatmul.msk.f32.vlgmr.msra.gmra.mxu0 %vm439_vm0, %v476_v60 }
 0x13a   : > { %1358 = vmatmul.msk.f32.vlgmr.msra.gmra.mxu2 %vm439_vm0, %v476_v60  ;;  %1363 = vmatmul.msk.f32.vlgmr.msra.gmra.mxu3 %vm439_vm0, %v476_v60 }
 0x13b   : > { %791 = vmatpush.msrb.mxu2 %v517_v14 }
 0x142   : > { %1362 = vmatmul.msk.f32.vlgmr.msrb.gmra.mxu2 %vm439_vm0, %v476_v60 }
 0x1a6   : > { %v593_v16 = vpop.f32.mrf.mxu0 }
 0x1a7   : > { %v693_v17 = vpop.f32.mrf.mxu1  ;;  %v594_v30 = vadd.f32 %v1428_v25, %v593_v16 }
 0x1a8   : > { %v694_v18 = vadd.f32 %v1429_v15, %v693_v17 }
 0x1aa   : > { %1366 = vmatpush.xpose.msk.msra.mxu1 %vm816_vm5, %v694_v18 }
 0x1ac   : > { %v613_v21 = vpop.f32.mrf.mxu2 }
 0x1ad   : > { %v614_v23 = vadd.f32 %v1430_v19, %v613_v21  ;;  %v653_v24 = vpop.f32.mrf.mxu3 }
 0x1ae   : > { %v673_v26 = vpop.f32.mrf.mxu0  ;;  %v654_v39 = vadd.f32 %v1431_v34, %v653_v24 }
 0x1af   : > { %v674_v27 = vadd.f32 %v1432_v20, %v673_v26  ;;  %v773_v28 = vpop.f32.mrf.mxu1  ;;  %1367 = vmatmul.msk.f32.vlgmr.msra.gmra.mxu1 %vm816_vm5, %v614_v23 }
 0x1b0   : > { %v774_v29 = vadd.f32 %v1433_v22, %v773_v28 }
 0x1b1   : > { %1364 = vmatpush.xpose.msk.msrb.mxu0 %vm816_vm5, %v674_v27 }
 0x1b2   : > { %1006 = vmatpush.msrb.mxu1 %v774_v29  ;;  %v1057_v29 = vld [vmem:[%s2006_s5] sm:$0xff] }
 0x1b4   : > { %v633_v33 = vpop.f32.mrf.mxu2  ;;  %1365 = vmatmul.msk.f32.vlgmr.msrb.gmra.mxu0 %vm816_vm5, %v594_v30  ;;  %1102 = vmatpush.msra.mxu1 %v1057_v29  ;;  %v1059_v30 = vld [vmem:[%s2006_s5 + $0x10] sm:$0xff] }
 0x1b5   : > { %v733_v35 = vpop.f32.mrf.mxu3  ;;  %v634_v47 = vadd.f32 %v1434_v42, %v633_v33  ;;  %v1440_v42 = vld [vmem:[%s2007_s6] ss:$0 sm:$0xff] }
 0x1b6   : > { %v734_v36 = vadd.f32 %v1435_v31, %v733_v35  ;;  %v753_v37 = vpop.f32.mrf.mxu0  ;;  %v1058_v31 = vld [vmem:[%s2006_s5 + $0x8] sm:$0xff] }
 0x1b7   : > { %v754_v38 = vadd.f32 %v1436_v32, %v753_v37  ;;  %v1060_v32 = vld [vmem:[%s2006_s5 + $0x18] sm:$0xff] }
 0x1b8   : > { %1370 = vmatpush.xpose.msk.msrb.mxu3 %vm816_vm5, %v734_v36 }
 0x1b9   : > { %983 = vmatpush.msra.mxu0 %v754_v38 }
 0x1bb   : > { %1371 = vmatmul.msk.f32.vlgmr.msrb.gmra.mxu3 %vm816_vm5, %v654_v39  ;;  %1079 = vmatpush.msrb.mxu0 %v1058_v31 }
 0x1bd   : > { %v713_v43 = vpop.f32.mrf.mxu2  ;;  %v813_v45 = vpop.f32.mrf.mxu3 }
 0x1be   : > { %v714_v44 = vadd.f32 %v1437_v40, %v713_v43  ;;  %v814_v46 = vadd.f32 %v1438_v41, %v813_v45 }
 0x1c0   : > { %1368 = vmatpush.xpose.msk.msra.mxu2 %vm816_vm5, %v714_v44  ;;  %1052 = vmatpush.msra.mxu3 %v814_v46 }
 0x1c2   : > { %1149 = vmatpush.msrb.mxu3 %v1060_v32 }
 0x1c3   : > { %1369 = vmatmul.msk.f32.vlgmr.msra.gmra.mxu2 %vm816_vm5, %v634_v47 }
 0x1c5   : > { %v793_v49 = vpop.f32.mrf.mxu2 }
 0x1c6   : > { %v794_v50 = vadd.f32 %v1439_v48, %v793_v49 }
 0x1c8   : > { %1029 = vmatpush.msrb.mxu2 %v794_v50 }
 0x1ca   : > { %1125 = vmatpush.msra.mxu2 %v1059_v30 }
 0x22c   : > { %v866_v53 = vpop.f32.mrf.mxu1 }
 0x22d   : > { %v924_v54 = vsel %vm816_vm5, %v866_v53, -inf }
 0x231   : > { %v840_v51 = vpop.f32.mrf.mxu0 }
 0x232   : > { %v921_v52 = vsel %vm816_vm5, %v840_v51, -inf }
 0x233   : > { %922 = vmax.xlane.f32.xlu2 %v921_v52 }
 0x23b   : > { %925 = vmax.xlane.f32.xlu2 %v924_v54  ;;  %v1194_v54 = vld [vmem:[%s2010_s9 + $0x8] sm:$0xff] }
 0x23e   : > { %v918_v57 = vpop.f32.mrf.mxu3 }
 0x23f   : > { %v930_v58 = vsel %vm816_vm5, %v918_v57, -inf }
 0x246   : > { %v892_v55 = vpop.f32.mrf.mxu2 }
 0x247   : > { %v927_v56 = vsel %vm816_vm5, %v892_v55, -inf }
 0x248   : > { %928 = vmax.xlane.f32.xlu1 %v927_v56 }
 0x250   : > { %931 = vmax.xlane.f32.xlu1 %v930_v58 }
 0x2a6   : > { %v923_v59 = vpop.xlane.xlu2 %922 }
 0x2a7   : > { %v933_v60 = vsub.f32 %v840_v51, %v923_v59 }
 0x2a9   : > { %v937_v61 = vmul.f32 1.442695, %v933_v60 }
 0x2ab   : > { %1449 = vpow2.f32 %v937_v61 }
 0x2ae   : > { %v926_v1 = vpop.xlane.xlu2 %925 }
 0x2af   : > { %v934_v4 = vsub.f32 %v866_v53, %v926_v1  ;;  %v1196_v53 = vld [vmem:[%s2010_s9 + $0x18] sm:$0xff] }
 0x2b1   : > { %v1450_v62 = vpop.eup %1449  ;;  %v939_v6 = vmul.f32 1.442695, %v934_v4 }
 0x2b2   : > { %v945_v63 = vsel %vm816_vm5, %v1450_v62, 0.0 }
 0x2b3   : > { %946 = vadd.xlane.f32.xlu2 %v945_v63 }
 0x2bb   : > { %v929_v2 = vpop.xlane.xlu1 %928 }
 0x2bc   : > { %v935_v3 = vsub.f32 %v892_v55, %v929_v2  ;;  %v1193_v55 = vld [vmem:[%s2010_s9] sm:$0xff] }
 0x2bd   : > { %v1441_v2 = vld [vmem:[%s2008_s7] ss:$0 sm:$0xff] }
 0x2be   : > { %v941_v5 = vmul.f32 1.442695, %v935_v3 }
 0x2c0   : > { %1451 = vpow2.f32 %v941_v5 }
 0x2c1   : > { %1453 = vpow2.f32 %v939_v6 }
 0x2c3   : > { %v932_v7 = vpop.xlane.xlu1 %931 }
 0x2c4   : > { %v936_v9 = vsub.f32 %v918_v57, %v932_v7  ;;  %v1240_v7 = vld [vmem:[%s2012_s11 + $0x38] sm:$0xff] }
 0x2c6   : > { %v1452_v10 = vpop.eup %1451  ;;  %v943_v11 = vmul.f32 1.442695, %v936_v9  ;;  %v1239_v9 = vld [vmem:[%s2012_s11 + $0x30] sm:$0xff] }
 0x2c7   : > { %v951_v12 = vsel %vm816_vm5, %v1452_v10, 0.0  ;;  %v1454_v13 = vpop.eup %1453 }
 0x2c8   : > { %1455 = vpow2.f32 %v943_v11  ;;  %952 = vadd.xlane.f32.xlu0 %v951_v12  ;;  %v948_v16 = vsel %vm816_vm5, %v1454_v13, 0.0  ;;  %v1237_v11 = vld [vmem:[%s2012_s11 + $0x20] sm:$0xff]  ;;  %v1236_v12 = vld [vmem:[%s2012_s11 + $0x18] sm:$0xff] }
 0x2ce   : > { %v1456_v14 = vpop.eup %1455 }
 0x2cf   : > { %v954_v15 = vsel %vm816_vm5, %v1456_v14, 0.0 }
 0x2d0   : > { %955 = vadd.xlane.f32.xlu1 %v954_v15  ;;  %949 = vadd.xlane.f32.xlu0 %v948_v16  ;;  %v1233_v15 = vld [vmem:[%s2012_s11] sm:$0xff] }
 0x2d1   : > { %v1443_v16 = vld [vmem:[%s2011_s10] ss:$0 sm:$0xff] }
 0x326   : > { %v947_v17 = vpop.xlane.xlu2 %946 }
 0x327   : > { %1457 = vrcp.f32 %v947_v17 }
 0x32d   : > { %v1458_v18 = vpop.eup %1457 }
 0x32e   : > { %v961_v19 = vmul.f32 %v1458_v18, %v1450_v62 }
 0x330   : > { %1372 = vmatmul.msk.f32.vlgmr.msra.gmra.mxu0 %vm816_vm5, %v961_v19 }
 0x331   : > { %1216 = vmatpush.msra.mxu0 %v1196_v53 }
 0x33b   : > { %v953_v20 = vpop.xlane.xlu0 %952 }
 0x33c   : > { %1459 = vrcp.f32 %v953_v20 }
 0x342   : > { %v1460_v21 = vpop.eup %1459 }
 0x343   : > { %v963_v22 = vmul.f32 %v1460_v21, %v1452_v10  ;;  %v956_v23 = vpop.xlane.xlu1 %955  ;;  %v950_v24 = vpop.xlane.xlu0 %949  ;;  %v1238_v10 = vld [vmem:[%s2012_s11 + $0x28] sm:$0xff] }
 0x344   : > { %1461 = vrcp.f32 %v956_v23 }
 0x345   : > { %1463 = vrcp.f32 %v950_v24  ;;  %1374 = vmatmul.msk.f32.vlgmr.msrb.gmra.mxu2 %vm816_vm5, %v963_v22 }
 0x34a   : > { %v1462_v25 = vpop.eup %1461 }
 0x34b   : > { %v1464_v26 = vpop.eup %1463  ;;  %v964_v27 = vmul.f32 %v1462_v25, %v1456_v14  ;;  %v1234_v14 = vld [vmem:[%s2012_s11 + $0x8] sm:$0xff] }
 0x34c   : > { %v962_v28 = vmul.f32 %v1464_v26, %v1454_v13  ;;  %v1235_v13 = vld [vmem:[%s2012_s11 + $0x10] sm:$0xff] }
 0x34d   : > { %1375 = vmatmul.msk.f32.vlgmr.msra.gmra.mxu3 %vm816_vm5, %v964_v27 }
 0x34e   : > { %1373 = vmatmul.msk.f32.vlgmr.msrb.gmra.mxu1 %vm816_vm5, %v962_v28  ;;  %v1444_v28 = vld [vmem:[%s2013_s12] ss:$0 sm:$0xff] }
 0x34f   : > { %1257 = vmatpush.msrb.mxu1 %v1240_v7 }
 0x351   : > { %1258 = vmatpush.msrb.mxu1 %v1239_v9 }
 0x353   : > { %1259 = vmatpush.msrb.mxu1 %v1238_v10 }
 0x355   : > { %1260 = vmatpush.msrb.mxu1 %v1237_v11 }
 0x357   : > { %1261 = vmatpush.msrb.mxu1 %v1236_v12 }
 0x359   : > { %1262 = vmatpush.msrb.mxu1 %v1235_v13 }
 0x35b   : > { %1263 = vmatpush.msrb.mxu1 %v1234_v14 }
 0x35d   : > { %1264 = vmatpush.msrb.mxu1 %v1233_v15 }
 0x3ad   : > { %v985_v33 = vpop.f32.mrf.mxu0 }
 0x3ae   : > { %1377 = vmatmul.msk.f32.vlgmr.msra.gmra.mxu1 %vm816_vm5, %v985_v33 }
 0x3c8   : > { %v1031_v34 = vpop.f32.mrf.mxu2 }
 0x3c9   : > { %1378 = vmatmul.msk.f32.vlgmr.msra.gmra.mxu2 %vm816_vm5, %v1031_v34 }
 0x3cb   : > { %v1008_v35 = vpop.f32.mrf.mxu1 }
 0x3cc   : > { %1376 = vmatmul.msk.f32.vlgmr.msrb.gmra.mxu0 %vm816_vm5, %v1008_v35 }
 0x3d0   : > { %v1054_v36 = vpop.f32.mrf.mxu3 }
 0x3d1   : > { %1379 = vmatmul.msk.f32.vlgmr.msrb.gmra.mxu3 %vm816_vm5, %v1054_v36 }
 0x42b   : > { %v1104_v38 = vpop.f32.mrf.mxu1 }
 0x449   : > { %v1081_v37 = vpop.f32.mrf.mxu0 }
 0x44a   : > { %v1105_v40 = vadd.f32 %v1104_v38, %v1081_v37 }
 0x44c   : > { %v1127_v39 = vpop.f32.mrf.mxu2 }
 0x44d   : > { %v1130_v41 = vadd.f32 %v1127_v39, %v1105_v40 }
 0x454   : > { %v1151_v43 = vpop.f32.mrf.mxu3 }
 0x455   : > { %v1154_v44 = vadd.f32 %v1151_v43, %v1130_v41 }
 0x457   : > { %v1159_v45 = vadd.f32 %v1440_v42, %v1154_v44 }
 0x459   : > { %v1910_v46 = vadd.f32 %v1159_v45, %v1657_v0  ;;  %v1195_v0 = vld [vmem:[%s2010_s9 + $0x10] sm:$0xff] }
 0x45a   : > { %1217 = vmatpush.msra.mxu0 %v1195_v0 }
 0x45b   : > { %v1163_v47 = vsel %vm439_vm0, %v1910_v46, 0.0 }
 0x45c   : > { %1164 = vadd.xlane.f32.xlu1 %v1163_v47  ;;  %1218 = vmatpush.msra.mxu0 %v1194_v54 }
 0x45e   : > { %1219 = vmatpush.msra.mxu0 %v1193_v55 }
 0x4cf   : > { %v1165_v48 = vpop.xlane.xlu1 %1164 }
 0x4d0   : > { %v1166_v49 = vmul.f32 %v1165_v48, %v1661_v8 }
 0x4d2   : > { %v1167_v50 = vsub.f32 %v1910_v46, %v1166_v49 }
 0x4d4   : > { %v1168_v51 = vmul.f32 %v1167_v50, %v1167_v50 }
 0x4d6   : > { %v1169_v52 = vsel %vm439_vm0, %v1168_v51, 0.0 }
 0x4d7   : > { %1170 = vadd.xlane.f32.xlu2 %v1169_v52 }
 0x54a   : > { %v1171_v56 = vpop.xlane.xlu2 %1170 }
 0x54b   : > { %v1172_v57 = vmul.f32 %v1171_v56, %v1661_v8  ;;  %v1442_v8 = vld [vmem:[%s2009_s8] ss:$0 sm:$0xff] }
 0x54d   : > { %v1173_v58 = vadd.f32 1e-06, %v1172_v57 }
 0x54f   : > { %1465 = vrsqrt.f32 %v1173_v58  ;;  %vm1180_vm7 = vweird.f32 %v1173_v58 }
 0x555   : > { %v1466_v59 = vpop.eup %1465 }
 0x556   : > { %v1175_v60 = vmul.f32 %v1466_v59, %v1173_v58  ;;  %vm1181_vm6 = vweird.f32 %v1466_v59 }
 0x557   : > { %vm1182_vm8 = vmor %vm1180_vm7, %vm1181_vm6 }
 0x558   : > { %v1176_v61 = vmul.f32 %v1466_v59, %v1175_v60 }
 0x55a   : > { %v1177_v62 = vmul.f32 0.5, %v1176_v61 }
 0x55c   : > { %v1178_v63 = vsub.f32 1.5, %v1177_v62 }
 0x55e   : > { %v1179_v1 = vmul.f32 %v1466_v59, %v1178_v63 }
 0x560   : > { %v1183_v3 = vsel %vm1182_vm8, %v1466_v59, %v1179_v1 }
 0x561   : > { %v1184_v4 = vmul.f32 %v1183_v3, %v1167_v50 }
 0x563   : > { %v1188_v5 = vmul.f32 %v1441_v2, %v1184_v4 }
 0x565   : > { %v1192_v6 = vadd.f32 %v1442_v8, %v1188_v5 }
 0x567   : > { %1380 = vmatmul.msk.f32.vlgmr.msra.gmra.mxu0 %vm439_vm0, %v1192_v6 }
 0x5e4   : > { %v1221_v17 = vpop.f32.mrf.mxu0 }
 0x5e5   : > { %v1222_v18 = vadd.f32 %v1443_v16, %v1221_v17 }
 0x5e7   : > { %v1225_v19 = vmul.f32 0.044715, %v1222_v18  ;;  %v1224_v25 = vmul.f32 0.5, %v1222_v18 }
 0x5e9   : > { %v1226_v20 = vmul.f32 %v1225_v19, %v1222_v18 }
 0x5eb   : > { %v1227_v21 = vmul.f32 %v1226_v20, %v1222_v18 }
 0x5ed   : > { %v1228_v22 = vadd.f32 %v1227_v21, %v1222_v18 }
 0x5ef   : > { %v1229_v23 = vmul.f32 0.7978846, %v1228_v22 }
 0x5f1   : > { %1467 = vtanh.f32 %v1229_v23 }
 0x5f7   : > { %v1468_v24 = vpop.eup %1467 }
 0x5f8   : > { %v1231_v26 = vadd.f32 1.0, %v1468_v24 }
 0x5fa   : > { %v1232_v27 = vmul.f32 %v1231_v26, %v1224_v25 }
 0x5fc   : > { %1381 = vmatmul.msk.f32.vlgmr.msrb.gmra.mxu1 %vm1245_vm9, %v1232_v27 }
 0x679   : > { %v1266_v29 = vpop.f32.mrf.mxu1 }
 0x67a   : > { %v1267_v30 = vadd.f32 %v1444_v28, %v1266_v29 }
 0x67c   : > { %v1269_v31 = vadd.f32 %v1267_v30, %v1910_v46 }
 0x67e   : > { %1270 = vst.msk [vmem:[%s431_s16] sm:$0xff] %vm439_vm0, %v1269_v31 }
 0x67f   : > { %1496 = shalt.err (!%p1493_p3)
}
 0x680   : > { %1386 = dma.vmem_to_hbm [thread:$0]  (%p1642_p5), %s1285_s20, 128, %s1287_s1, %s1272_s29  }
 0x681 PF: > { %p1392_p4 = scmp.ge.s32.totalorder %s1531_s28, 2  ;;  %s1298_s21 = sand.u32 1, %s1519_s25  }
 0x682   : > { %s1299_s15 = scalar_lea.sflag [#allocation3], %s1298_s21 }
 0x683   : > { %p1389_p7 = pnand %p1392_p4, %p1646_p6 }
 0x685   : > { %p1390_p8 = pneg %p1389_p7 }
 0x687   : > { %1514 = dma.done.wait (%p1390_p8), %s1299_s15, 128  }
 0x688   : > { %1516 = vsyncadd (%p1390_p8), %s1299_s15, 4294967168  ;;  %s2024_s2 = sld [smem:[#allocation5_spill]]  ;;  %p23_p9 = scmp.ge.s32.totalorder %s1629_s14, 4  }
 0x689   : > { %s2025_s25 = smov %s1523_s26  ;;  %s2026_s26 = smov %s1527_s27 }
 0x68a   : > { %s2028_s28 = smov %s1629_s14  ;;  %25 = sbr.rel (!%p23_p9) target bundleno = 7 (0x7), region = 107 }
 0x68e   : > { %s2027_s27 = smov %s2024_s2 }
 0x68f   :  { %1305 = vsyncpa [#allocation3], 1 }
 0x690   :  { %1307 = vsyncpa [#allocation3 + $0x1], 1 }

</bundles_post_ra>
